<compile_context>
chip_gen: v7x
topology: tpu7x:2x2x1
jax: 0.10.0
libtpu: 0.0.40
codegen_flags: <defaults>
</compile_context>

<pallas_src>
import functools

import jax
import jax.numpy as jnp
from jax.experimental import pallas as pl
from jax.experimental.pallas import tpu as pltpu


NEG_SLOPE = 0.01    # F.leaky_relu default negative_slope
LANE = 128          # TPU lane width: all fan-outs padded to a multiple of this
MAX_TILE_M = 2048   # VMEM-derived cap on the batch tile for very large B


def _round_up(n, m):
    return ((n + m - 1) // m) * m


def _leaky_relu(x):
    return jnp.where(x > 0, x, NEG_SLOPE * x)


def mlp_kernel(x_ref,
               w1_ref, b1_ref,
               w2_ref, b2_ref,
               w3_ref, b3_ref,
               w4_ref, b4_ref,
               o_ref, *, act_dtype):
    """Fused 4-layer MLP: bf16 MXU matmuls (f32 accumulate), lane-dense elementwise.

    NOTE: every op here is strictly row-wise; that is what makes the masked
    tail tile (garbage pad rows beyond the batch) safe.  Do not add any
    cross-row reduction/normalization to this epilogue without masking it.
    """
    x = x_ref[...]                                            # (tile_m, in_ch) bf16

    h = jnp.dot(x, w1_ref[...], preferred_element_type=jnp.float32) + b1_ref[...]
    h = _leaky_relu(h.astype(act_dtype))
    # dropout1: identity (eval mode)

    h = jnp.dot(h.astype(jnp.bfloat16), w2_ref[...],
                preferred_element_type=jnp.float32) + b2_ref[...]
    h = _leaky_relu(h.astype(act_dtype))
    # dropout2: identity (eval mode)

    h = jnp.dot(h.astype(jnp.bfloat16), w3_ref[...],
                preferred_element_type=jnp.float32) + b3_ref[...]
    h = _leaky_relu(h.astype(act_dtype))

    h = jnp.dot(h.astype(jnp.bfloat16), w4_ref[...],
                preferred_element_type=jnp.float32) + b4_ref[...]

    # Stable sigmoid: z = exp(-|h|) in (0, 1], so the approx reciprocal never
    # sees inf.  exp and reciprocal both use the EUP slot (frees VALU slots);
    # approx=True adds ~1e-3 relative error, well inside the bf16 tolerance.
    z = jnp.exp(-jnp.abs(h))
    r = pl.reciprocal(1.0 + z, approx=True)
    o_ref[...] = jnp.where(h >= 0, r, z * r).astype(o_ref.dtype)


def _device_kind():
    try:
        return jax.devices()[0].device_kind or ""
    except Exception:
        return ""


def _pick_tile_m(batch, device_kind):
    """Generation-aware batch tiling.

    v5e/v6e: one TensorCore -> a multi-step grid is a serial loop, so one tile
    covering the whole batch (VMEM-capped) removes per-step overhead and
    pad-row waste.  v7x: two TensorCores share the "parallel" grid axis ->
    hand each a balanced tile instead of a full tile + mostly-padding tail.
    """
    dk = device_kind.lower()
    if batch <= 16:
        return batch
    if "v7" in dk:
        tile = _round_up(pl.cdiv(batch, 2), 16)
    else:
        tile = batch
    return min(tile, MAX_TILE_M)


def my_mlp_forward(x, params, *, tile_m=None):
    """x: (B, in_channel) float32.  params: dict name -> (W, b), W is (fan_in, fan_out)."""
    B, in_channel = x.shape
    w1, b1 = params["fc1"]
    w2, b2 = params["fc2"]
    w3, b3 = params["fc3"]
    w4, b4 = params["fc4"]
    hidden = w1.shape[1]
    out_channel = w4.shape[1]

    # ---- Lane-dense zero padding (exact) ---------------------------------
    # Pad each layer's fan-out up to a multiple of 128 and the matching
    # fan-in rows of the following layer's weights.  Padded activation
    # columns are exactly 0 (zero weights, zero bias, leaky_relu(0)=0) and
    # the padded fan-in rows are zero, so results are identical to the
    # unpadded math; the final store becomes an unmasked lane-dense vst.
    # Do NOT pad in_channel (x columns): K=32 is already one MXU pass.
    hid_p = _round_up(hidden, LANE)        # fc1/fc2 fan-out, fc2/fc3 fan-in
    mid_p = _round_up(in_channel, LANE)    # fc3 fan-out, fc4 fan-in
    out_p = _round_up(out_channel, LANE)   # fc4 fan-out

    def pad2(a, rows, cols):
        return jnp.pad(a, ((0, rows - a.shape[0]), (0, cols - a.shape[1])))

    w1p, b1p = pad2(w1, in_channel, hid_p), pad2(b1, 1, hid_p)
    w2p, b2p = pad2(w2, hid_p, hid_p),      pad2(b2, 1, hid_p)
    w3p, b3p = pad2(w3, hid_p, mid_p),      pad2(b3, 1, mid_p)
    w4p, b4p = pad2(w4, mid_p, out_p),      pad2(b4, 1, out_p)

    # MXU operands in bf16 (cast once, outside the kernel); biases stay f32.
    xb = x.astype(jnp.bfloat16)
    w1b, w2b, w3b, w4b = (w.astype(jnp.bfloat16) for w in (w1p, w2p, w3p, w4p))

    device_kind = _device_kind()
    if tile_m is None:
        tile_m = _pick_tile_m(B, device_kind)
    grid = (pl.cdiv(B, tile_m),)

    # leaky_relu dtype: bf16 VALUs exist on v6e/v7x; keep f32 on v5e/older.
    dk = device_kind.lower()
    act_dtype = jnp.bfloat16 if ("v6" in dk or "v7" in dk) else jnp.float32

    # Weights & biases: full-array constant-index blocks -> VMEM-resident
    # across grid steps (no re-DMA).  (pl.Buffered(1) single-buffering would
    # be marginal extra hygiene at these sizes; omitted for portability.)
    def full_spec(shape):
        return pl.BlockSpec(shape, lambda i: (0,) * len(shape))

    kernel = functools.partial(mlp_kernel, act_dtype=act_dtype)

    out_padded = pl.pallas_call(
        kernel,
        # bf16 output: an 8->128 f32 pad would 16x the HBM write bytes per row;
        # sigmoid probabilities don't need f32.
        out_shape=jax.ShapeDtypeStruct((B, out_p), jnp.bfloat16),
        grid_spec=pltpu.PrefetchScalarGridSpec(
            num_scalar_prefetch=0,
            grid=grid,
            in_specs=[
                pl.BlockSpec((tile_m, in_channel), lambda i: (i, 0)),
                full_spec(w1b.shape), full_spec(b1p.shape),
                full_spec(w2b.shape), full_spec(b2p.shape),
                full_spec(w3b.shape), full_spec(b3p.shape),
                full_spec(w4b.shape), full_spec(b4p.shape),
            ],
            out_specs=pl.BlockSpec((tile_m, out_p), lambda i: (i, 0)),
        ),
        compiler_params=pltpu.CompilerParams(
            dimension_semantics=("parallel",)),
    )(xb, w1b, b1p, w2b, b2p, w3b, b3p, w4b, b4p)

    # Slice off pad columns; restore the module's f32 output dtype (tiny view).
    return out_padded[:, :out_channel].astype(jnp.float32)


def init_params(key, in_channel, out_channel):
    """Deterministic init matching nn.Linear shapes (stored as (fan_in, fan_out))."""
    hidden = 2 * in_channel
    dims = [(in_channel, hidden),       # fc1
            (hidden, hidden),           # fc2
            (hidden, in_channel),       # fc3
            (in_channel, out_channel)]  # fc4
    names = ["fc1", "fc2", "fc3", "fc4"]
    params = {}
    for name, (fin, fout) in zip(names, dims):
        key, kw, kb = jax.random.split(key, 3)
        bound = 1.0 / jnp.sqrt(fin)
        w = jax.random.uniform(kw, (fin, fout), jnp.float32, -bound, bound)
        b = jax.random.uniform(kb, (1, fout), jnp.float32, -bound, bound)
        params[name] = (w, b)
    return params


def reference_forward(x, params):
    h = x
    for name in ["fc1", "fc2", "fc3"]:
        w, b = params[name]
        h = h @ w + b
        h = jnp.where(h > 0, h, NEG_SLOPE * h)
    w, b = params["fc4"]
    h = h @ w + b
    return jax.nn.sigmoid(h)


if __name__ == "__main__":
    in_channel, out_channel = 32, 8
    batch = 384   # single 384-row tile on v5e/v6e, two balanced 192-row tiles on v7x

    key = jax.random.PRNGKey(0)
    key, kx = jax.random.split(key)
    x = jax.random.normal(kx, (batch, in_channel), jnp.float32)
    params = init_params(key, in_channel, out_channel)

    out = my_mlp_forward(x, params)
    out = jax.block_until_ready(out)

    ref = reference_forward(x, params)
    assert out.shape == (batch, out_channel)
    # bf16 MXU operands / bf16 output / approx reciprocal vs. f32 reference.
    assert jnp.allclose(out, ref, atol=5e-2, rtol=5e-2), \
        float(jnp.max(jnp.abs(out - ref)))

    print("KERNEL_OK")
</pallas_src>

<mosaic_0001>
module attributes {stable_mosaic.version = 11 : i64} {
  func.func @mlp_kernel(%arg0: i32, %arg1: memref<384x32xbf16, #tpu.memory_space<vmem>>, %arg2: memref<32x128xbf16, #tpu.memory_space<vmem>>, %arg3: memref<1x128xf32, #tpu.memory_space<vmem>>, %arg4: memref<128x128xbf16, #tpu.memory_space<vmem>>, %arg5: memref<1x128xf32, #tpu.memory_space<vmem>>, %arg6: memref<128x128xbf16, #tpu.memory_space<vmem>>, %arg7: memref<1x128xf32, #tpu.memory_space<vmem>>, %arg8: memref<128x128xbf16, #tpu.memory_space<vmem>>, %arg9: memref<1x128xf32, #tpu.memory_space<vmem>>, %arg10: memref<384x128xbf16, #tpu.memory_space<vmem>>) attributes {dimension_semantics = [#tpu.dimension_semantics<parallel>], iteration_bounds = array<i64: 1>, scalar_prefetch = 0 : i64, scratch_operands = 0 : i64, tpu.core_type = #tpu.core_type<tc>, window_params = [{transform_indices = @transform_0, window_bounds = array<i64: 384, 32>}, {pipeline_mode = #tpu.pipeline_mode<synchronous>, transform_indices = @transform_1, window_bounds = array<i64: 32, 128>}, {pipeline_mode = #tpu.pipeline_mode<synchronous>, transform_indices = @transform_2, window_bounds = array<i64: 1, 128>}, {pipeline_mode = #tpu.pipeline_mode<synchronous>, transform_indices = @transform_3, window_bounds = array<i64: 128, 128>}, {pipeline_mode = #tpu.pipeline_mode<synchronous>, transform_indices = @transform_4, window_bounds = array<i64: 1, 128>}, {pipeline_mode = #tpu.pipeline_mode<synchronous>, transform_indices = @transform_5, window_bounds = array<i64: 128, 128>}, {pipeline_mode = #tpu.pipeline_mode<synchronous>, transform_indices = @transform_6, window_bounds = array<i64: 1, 128>}, {pipeline_mode = #tpu.pipeline_mode<synchronous>, transform_indices = @transform_7, window_bounds = array<i64: 128, 128>}, {pipeline_mode = #tpu.pipeline_mode<synchronous>, transform_indices = @transform_8, window_bounds = array<i64: 1, 128>}, {transform_indices = @transform_9, window_bounds = array<i64: 384, 128>}]} {
    %c0 = arith.constant 0 : index
    %c0_0 = arith.constant 0 : index
    %0 = vector.load %arg1[%c0, %c0_0] : memref<384x32xbf16, #tpu.memory_space<vmem>>, vector<384x32xbf16>
    %c0_1 = arith.constant 0 : index
    %c0_2 = arith.constant 0 : index
    %1 = vector.load %arg2[%c0_1, %c0_2] : memref<32x128xbf16, #tpu.memory_space<vmem>>, vector<32x128xbf16>
    %cst = arith.constant dense<0.000000e+00> : vector<384x128xf32>
    %2 = tpu.matmul %0, %1, %cst {dimension_numbers = #tpu.dot_dimension_numbers<[1], [0], [0], [1], [0, 0, 1, 1], [], []>} : vector<384x32xbf16>, vector<32x128xbf16>, vector<384x128xf32> -> vector<384x128xf32>
    %c0_3 = arith.constant 0 : index
    %c0_4 = arith.constant 0 : index
    %3 = vector.load %arg3[%c0_3, %c0_4] : memref<1x128xf32, #tpu.memory_space<vmem>>, vector<1x128xf32>
    %4 = vector.broadcast %3 : vector<1x128xf32> to vector<384x128xf32>
    %5 = arith.addf %2, %4 : vector<384x128xf32>
    %cst_5 = arith.constant 0.000000e+00 : f32
    %6 = vector.broadcast %cst_5 : f32 to vector<384x128xf32>
    %7 = arith.cmpf ogt, %5, %6 : vector<384x128xf32>
    %cst_6 = arith.constant 0.00999999977 : f32
    %8 = vector.broadcast %cst_6 : f32 to vector<384x128xf32>
    %9 = arith.mulf %8, %5 : vector<384x128xf32>
    %10 = arith.select %7, %5, %9 : vector<384x128xi1>, vector<384x128xf32>
    %11 = arith.truncf %10 : vector<384x128xf32> to vector<384x128xbf16>
    %c0_7 = arith.constant 0 : index
    %c0_8 = arith.constant 0 : index
    %12 = vector.load %arg4[%c0_7, %c0_8] : memref<128x128xbf16, #tpu.memory_space<vmem>>, vector<128x128xbf16>
    %cst_9 = arith.constant dense<0.000000e+00> : vector<384x128xf32>
    %13 = tpu.matmul %11, %12, %cst_9 {dimension_numbers = #tpu.dot_dimension_numbers<[1], [0], [0], [1], [0, 0, 1, 1], [], []>} : vector<384x128xbf16>, vector<128x128xbf16>, vector<384x128xf32> -> vector<384x128xf32>
    %c0_10 = arith.constant 0 : index
    %c0_11 = arith.constant 0 : index
    %14 = vector.load %arg5[%c0_10, %c0_11] : memref<1x128xf32, #tpu.memory_space<vmem>>, vector<1x128xf32>
    %15 = vector.broadcast %14 : vector<1x128xf32> to vector<384x128xf32>
    %16 = arith.addf %13, %15 : vector<384x128xf32>
    %cst_12 = arith.constant 0.000000e+00 : f32
    %17 = vector.broadcast %cst_12 : f32 to vector<384x128xf32>
    %18 = arith.cmpf ogt, %16, %17 : vector<384x128xf32>
    %cst_13 = arith.constant 0.00999999977 : f32
    %19 = vector.broadcast %cst_13 : f32 to vector<384x128xf32>
    %20 = arith.mulf %19, %16 : vector<384x128xf32>
    %21 = arith.select %18, %16, %20 : vector<384x128xi1>, vector<384x128xf32>
    %22 = arith.truncf %21 : vector<384x128xf32> to vector<384x128xbf16>
    %c0_14 = arith.constant 0 : index
    %c0_15 = arith.constant 0 : index
    %23 = vector.load %arg6[%c0_14, %c0_15] : memref<128x128xbf16, #tpu.memory_space<vmem>>, vector<128x128xbf16>
    %cst_16 = arith.constant dense<0.000000e+00> : vector<384x128xf32>
    %24 = tpu.matmul %22, %23, %cst_16 {dimension_numbers = #tpu.dot_dimension_numbers<[1], [0], [0], [1], [0, 0, 1, 1], [], []>} : vector<384x128xbf16>, vector<128x128xbf16>, vector<384x128xf32> -> vector<384x128xf32>
    %c0_17 = arith.constant 0 : index
    %c0_18 = arith.constant 0 : index
    %25 = vector.load %arg7[%c0_17, %c0_18] : memref<1x128xf32, #tpu.memory_space<vmem>>, vector<1x128xf32>
    %26 = vector.broadcast %25 : vector<1x128xf32> to vector<384x128xf32>
    %27 = arith.addf %24, %26 : vector<384x128xf32>
    %cst_19 = arith.constant 0.000000e+00 : f32
    %28 = vector.broadcast %cst_19 : f32 to vector<384x128xf32>
    %29 = arith.cmpf ogt, %27, %28 : vector<384x128xf32>
    %cst_20 = arith.constant 0.00999999977 : f32
    %30 = vector.broadcast %cst_20 : f32 to vector<384x128xf32>
    %31 = arith.mulf %30, %27 : vector<384x128xf32>
    %32 = arith.select %29, %27, %31 : vector<384x128xi1>, vector<384x128xf32>
    %33 = arith.truncf %32 : vector<384x128xf32> to vector<384x128xbf16>
    %c0_21 = arith.constant 0 : index
    %c0_22 = arith.constant 0 : index
    %34 = vector.load %arg8[%c0_21, %c0_22] : memref<128x128xbf16, #tpu.memory_space<vmem>>, vector<128x128xbf16>
    %cst_23 = arith.constant dense<0.000000e+00> : vector<384x128xf32>
    %35 = tpu.matmul %33, %34, %cst_23 {dimension_numbers = #tpu.dot_dimension_numbers<[1], [0], [0], [1], [0, 0, 1, 1], [], []>} : vector<384x128xbf16>, vector<128x128xbf16>, vector<384x128xf32> -> vector<384x128xf32>
    %c0_24 = arith.constant 0 : index
    %c0_25 = arith.constant 0 : index
    %36 = vector.load %arg9[%c0_24, %c0_25] : memref<1x128xf32, #tpu.memory_space<vmem>>, vector<1x128xf32>
    %37 = vector.broadcast %36 : vector<1x128xf32> to vector<384x128xf32>
    %38 = arith.addf %35, %37 : vector<384x128xf32>
    %39 = math.absf %38 : vector<384x128xf32>
    %cst_26 = arith.constant 0.000000e+00 : f32
    %40 = vector.broadcast %cst_26 : f32 to vector<384x128xf32>
    %41 = arith.subf %40, %39 : vector<384x128xf32>
    %42 = math.exp %41 : vector<384x128xf32>
    %cst_27 = arith.constant 1.000000e+00 : f32
    %43 = vector.broadcast %cst_27 : f32 to vector<384x128xf32>
    %44 = arith.addf %43, %42 : vector<384x128xf32>
    %45 = tpu.reciprocal %44 {approx = true} : vector<384x128xf32> -> vector<384x128xf32>
    %cst_28 = arith.constant 0.000000e+00 : f32
    %46 = vector.broadcast %cst_28 : f32 to vector<384x128xf32>
    %47 = arith.cmpf oge, %38, %46 : vector<384x128xf32>
    %48 = arith.mulf %42, %45 : vector<384x128xf32>
    %49 = arith.select %47, %45, %48 : vector<384x128xi1>, vector<384x128xf32>
    %50 = arith.truncf %49 : vector<384x128xf32> to vector<384x128xbf16>
    %c0_29 = arith.constant 0 : index
    %c0_30 = arith.constant 0 : index
    %51 = vector.load %arg10[%c0_29, %c0_30] : memref<384x128xbf16, #tpu.memory_space<vmem>>, vector<384x128xbf16>
    tpu.vector_store %arg10[%c0_29, %c0_30], %50 {strides = array<i32>} : memref<384x128xbf16, #tpu.memory_space<vmem>>, vector<384x128xbf16>,
    return
  }
  func.func @transform_0(%arg0: i32) -> (i32, i32) {
    %c0_i32 = arith.constant 0 : i32
    %c0_i32_0 = arith.constant 0 : i32
    return %arg0, %c0_i32 : i32, i32
  }
  func.func @transform_1(%arg0: i32) -> (i32, i32) {
    %c0_i32 = arith.constant 0 : i32
    %c0_i32_0 = arith.constant 0 : i32
    %c0_i32_1 = arith.constant 0 : i32
    return %c0_i32, %c0_i32_0 : i32, i32
  }
  func.func @transform_2(%arg0: i32) -> (i32, i32) {
    %c0_i32 = arith.constant 0 : i32
    %c0_i32_0 = arith.constant 0 : i32
    %c0_i32_1 = arith.constant 0 : i32
    return %c0_i32, %c0_i32_0 : i32, i32
  }
  func.func @transform_3(%arg0: i32) -> (i32, i32) {
    %c0_i32 = arith.constant 0 : i32
    %c0_i32_0 = arith.constant 0 : i32
    %c0_i32_1 = arith.constant 0 : i32
    return %c0_i32, %c0_i32_0 : i32, i32
  }
  func.func @transform_4(%arg0: i32) -> (i32, i32) {
    %c0_i32 = arith.constant 0 : i32
    %c0_i32_0 = arith.constant 0 : i32
    %c0_i32_1 = arith.constant 0 : i32
    return %c0_i32, %c0_i32_0 : i32, i32
  }
  func.func @transform_5(%arg0: i32) -> (i32, i32) {
    %c0_i32 = arith.constant 0 : i32
    %c0_i32_0 = arith.constant 0 : i32
    %c0_i32_1 = arith.constant 0 : i32
    return %c0_i32, %c0_i32_0 : i32, i32
  }
  func.func @transform_6(%arg0: i32) -> (i32, i32) {
    %c0_i32 = arith.constant 0 : i32
    %c0_i32_0 = arith.constant 0 : i32
    %c0_i32_1 = arith.constant 0 : i32
    return %c0_i32, %c0_i32_0 : i32, i32
  }
  func.func @transform_7(%arg0: i32) -> (i32, i32) {
    %c0_i32 = arith.constant 0 : i32
    %c0_i32_0 = arith.constant 0 : i32
    %c0_i32_1 = arith.constant 0 : i32
    return %c0_i32, %c0_i32_0 : i32, i32
  }
  func.func @transform_8(%arg0: i32) -> (i32, i32) {
    %c0_i32 = arith.constant 0 : i32
    %c0_i32_0 = arith.constant 0 : i32
    %c0_i32_1 = arith.constant 0 : i32
    return %c0_i32, %c0_i32_0 : i32, i32
  }
  func.func @transform_9(%arg0: i32) -> (i32, i32) {
    %c0_i32 = arith.constant 0 : i32
    %c0_i32_0 = arith.constant 0 : i32
    return %arg0, %c0_i32 : i32, i32
  }
}

</mosaic_0001>

<bundles_post_ra>
// kernel: tpu_custom_call.1
= control target key start
LH: loop header
LB: loop body
LE: loop exit
PB: predicated region body
PF: predicated region fallthrough
CT: control target
= control target key end

     0   :  { %vm225_vm0 = vcmask 261120   ;;  %s4519_s0 = inlined_call_operand.vmem [shape: bf16[384,32], index: 0, kind: input, shape index: {}]   ;;  %s4520_s1 = inlined_call_operand.vmem [shape: bf16[32,128], index: 1, kind: input, shape index: {}]   ;;  %s4521_s2 = inlined_call_operand.vmem [shape: f32[1,128], index: 2, kind: input, shape index: {}]   ;;  %s4522_s3 = inlined_call_operand.vmem [shape: bf16[128,128], index: 3, kind: input, shape index: {}]   ;;  %s4523_s4 = inlined_call_operand.vmem [shape: f32[1,128], index: 4, kind: input, shape index: {}]   ;;  %s4524_s5 = inlined_call_operand.vmem [shape: bf16[128,128], index: 5, kind: input, shape index: {}]   ;;  %s4525_s6 = inlined_call_operand.vmem [shape: f32[1,128], index: 6, kind: input, shape index: {}]   ;;  %s4526_s7 = inlined_call_operand.vmem [shape: bf16[128,128], index: 7, kind: input, shape index: {}]   ;;  %s4527_s8 = inlined_call_operand.vmem [shape: f32[1,128], index: 8, kind: input, shape index: {}]   ;;  %s4528_s9 = inlined_call_operand.hbm [shape: bf16[384,128], index: 9, kind: output, shape index: {}]  }
   0x1   :  { %v3305_v0 = vld [vmem:[%s4520_s1] sm:$0xff]   ;;  %v3306_v1 = vld [vmem:[%s4520_s1 + $0x8] sm:$0xff]   ;;  %v3309_v4 = vld [vmem:[%s4519_s0 + $0x10] sm:$0xff]  }
   0x2   :  { %3042 = vmatprep.subr.bf16.mxu0 %v3305_v0  ;;  %v3307_v2 = vld [vmem:[%s4519_s0] sm:$0xff]   ;;  %v3308_v3 = vld [vmem:[%s4519_s0 + $0x8] sm:$0xff]   ;;  %v3310_v5 = vld [vmem:[%s4519_s0 + $0x18] sm:$0xff]  }
   0x3   :  { %3043 = vmatpush3.bf16.msra.mxu0 %v3305_v0  ;;  %3046 = vmatprep.mubr.msk.bf16.mxu0 %vm225_vm0, %v3307_v2  ;;  %v3311_v6 = vld [vmem:[%s4519_s0 + $0x20] sm:$0xff]   ;;  %v3312_v7 = vld [vmem:[%s4519_s0 + $0x28] sm:$0xff]   ;;  %v3313_v8 = vld [vmem:[%s4519_s0 + $0x30] sm:$0xff]  }
   0x4   :  { %3044 = vmatprep.subr.bf16.mxu0 %v3306_v1  ;;  %v3331_v9 = vld [vmem:[%s4522_s3] sm:$0xff]   ;;  %v3332_v10 = vld [vmem:[%s4522_s3 + $0x8] sm:$0xff]   ;;  %v3314_v11 = vld [vmem:[%s4519_s0 + $0x38] sm:$0xff]  }
   0x5   :  { %3094 = vmatprep.subr.bf16.mxu1 %v3331_v9  ;;  %v3315_v12 = vld [vmem:[%s4519_s0 + $0x40] sm:$0xff]   ;;  %v3333_v13 = vld [vmem:[%s4522_s3 + $0x10] sm:$0xff]   ;;  %v3334_v14 = vld [vmem:[%s4522_s3 + $0x18] sm:$0xff]  }
   0x6   :  { %3095 = vmatpush3.bf16.msra.mxu1 %v3331_v9  ;;  %v3316_v15 = vld [vmem:[%s4519_s0 + $0x48] sm:$0xff]   ;;  %v3335_v16 = vld [vmem:[%s4522_s3 + $0x20] sm:$0xff]   ;;  %v3317_v17 = vld [vmem:[%s4519_s0 + $0x50] sm:$0xff]  }
   0x7   :  { %3045 = vmatpush3.bf16.msra.mxu0 %v3306_v1  ;;  %3096 = vmatprep.subr.bf16.mxu1 %v3332_v10 }
   0xa   :  { %3047 = vmatmul.mubr.msk.bf16.vlgmr.msra.gmra.mrb[0].mxu0 %vm225_vm0, %v3308_v3  ;;  %3097 = vmatpush3.bf16.msra.mxu1 %v3332_v10 }
   0xb   :  { %3050 = vmatprep.mubr.msk.bf16.mxu0 %vm225_vm0, %v3309_v4  ;;  %3098 = vmatprep.subr.bf16.mxu1 %v3333_v13 }
   0xe   :  { %3099 = vmatpush3.bf16.msra.mxu1 %v3333_v13 }
   0xf   :  { %3100 = vmatprep.subr.bf16.mxu1 %v3334_v14 }
  0x12   :  { %3051 = vmatmul.mubr.msk.bf16.gmra.mrb[4].mxu0 %vm225_vm0, %v3310_v5  ;;  %3101 = vmatpush3.bf16.msra.mxu1 %v3334_v14 }
  0x13   :  { %3054 = vmatprep.mubr.msk.bf16.mxu0 %vm225_vm0, %v3311_v6  ;;  %3102 = vmatprep.subr.bf16.mxu1 %v3335_v16 }
  0x1a   :  { %3055 = vmatmul.mubr.msk.bf16.gmra.mrb[8].mxu0 %vm225_vm0, %v3312_v7 }
  0x1b   :  { %3058 = vmatprep.mubr.msk.bf16.mxu0 %vm225_vm0, %v3313_v8 }
  0x22   :  { %3059 = vmatmul.mubr.msk.bf16.gmra.mrb[12].mxu0 %vm225_vm0, %v3314_v11 }
  0x23   :  { %3062 = vmatprep.mubr.msk.bf16.mxu0 %vm225_vm0, %v3315_v12 }
  0x2a   :  { %3063 = vmatmul.mubr.msk.bf16.gmra.mrb[16].mxu0 %vm225_vm0, %v3316_v15 }
  0x2b   :  { %3066 = vmatprep.mubr.msk.bf16.mxu0 %vm225_vm0, %v3317_v17 }
  0x2c   :  { %14 = vsyncpa [#allocation3], 0  ;;  %3103 = vmatpush3.bf16.msra.mxu1 %v3335_v16  ;;  %v3318_v18 = vld [vmem:[%s4519_s0 + $0x58] sm:$0xff]   ;;  %v3319_v19 = vld [vmem:[%s4519_s0 + $0x60] sm:$0xff]  }
  0x2d   :  { %v3320_v20 = vld [vmem:[%s4519_s0 + $0x68] sm:$0xff]   ;;  %v3321_v21 = vld [vmem:[%s4519_s0 + $0x70] sm:$0xff]   ;;  %v3322_v22 = vld [vmem:[%s4519_s0 + $0x78] sm:$0xff]  }
  0x2e   :  { %v3323_v23 = vld [vmem:[%s4519_s0 + $0x80] sm:$0xff]   ;;  %v3324_v24 = vld [vmem:[%s4519_s0 + $0x88] sm:$0xff]   ;;  %v3325_v25 = vld [vmem:[%s4519_s0 + $0x90] sm:$0xff]  }
  0x2f   :  { %v3326_v26 = vld [vmem:[%s4519_s0 + $0x98] sm:$0xff]   ;;  %v3327_v27 = vld [vmem:[%s4519_s0 + $0xa0] sm:$0xff]   ;;  %v3328_v28 = vld [vmem:[%s4519_s0 + $0xa8] sm:$0xff]  }
  0x30   :  { %v3329_v29 = vld [vmem:[%s4519_s0 + $0xb0] sm:$0xff]   ;;  %v3336_v30 = vld [vmem:[%s4522_s3 + $0x28] sm:$0xff]   ;;  %v3330_v31 = vld [vmem:[%s4519_s0 + $0xb8] sm:$0xff]  }
  0x31   :  { %3104 = vmatprep.subr.bf16.mxu1 %v3336_v30  ;;  %v3337_v32 = vld [vmem:[%s4522_s3 + $0x30] sm:$0xff]   ;;  %v3338_v33 = vld [vmem:[%s4522_s3 + $0x38] sm:$0xff]   ;;  %v3339_v34 = vld [vmem:[%s4524_s5] sm:$0xff]  }
  0x32   :  { %3067 = vmatmul.mubr.msk.bf16.gmra.mrb[20].mxu0 %vm225_vm0, %v3318_v18  ;;  %3105 = vmatpush3.bf16.msra.mxu1 %v3336_v30  ;;  %v3340_v35 = vld [vmem:[%s4524_s5 + $0x8] sm:$0xff]   ;;  %v3341_v36 = vld [vmem:[%s4524_s5 + $0x10] sm:$0xff]   ;;  %v3342_v37 = vld [vmem:[%s4524_s5 + $0x18] sm:$0xff]  }
  0x33   :  { %3070 = vmatprep.mubr.msk.bf16.mxu0 %vm225_vm0, %v3319_v19  ;;  %3106 = vmatprep.subr.bf16.mxu1 %v3337_v32  ;;  %v3343_v38 = vld [vmem:[%s4524_s5 + $0x20] sm:$0xff]   ;;  %v3344_v39 = vld [vmem:[%s4524_s5 + $0x28] sm:$0xff]   ;;  %v3345_v40 = vld [vmem:[%s4524_s5 + $0x30] sm:$0xff]  }
  0x34   :  { %3158 = vmatprep.subr.bf16.mxu0 %v3339_v34  ;;  %v3346_v41 = vld [vmem:[%s4524_s5 + $0x38] sm:$0xff]   ;;  %v3778_v42 = vld [vmem:[%s4521_s2] ss:$0 sm:$0xff] }
  0x35   :  { %3159 = vmatpush3.bf16.msra.mxu0 %v3339_v34 }
  0x36   :  { %3107 = vmatpush3.bf16.msra.mxu1 %v3337_v32  ;;  %3160 = vmatprep.subr.bf16.mxu0 %v3340_v35 }
  0x37   :  { %3108 = vmatprep.subr.bf16.mxu1 %v3338_v33 }
  0x39   :  { %3161 = vmatpush3.bf16.msra.mxu0 %v3340_v35 }
  0x3a   :  { %3071 = vmatmul.mubr.msk.bf16.gmra.mrb[24].mxu0 %vm225_vm0, %v3320_v20  ;;  %3109 = vmatpush3.bf16.msra.mxu1 %v3338_v33 }
  0x3b   :  { %3074 = vmatprep.mubr.msk.bf16.mxu0 %vm225_vm0, %v3321_v21  ;;  %3162 = vmatprep.subr.bf16.mxu0 %v3341_v36 }
  0x3d   :  { %3163 = vmatpush3.bf16.msra.mxu0 %v3341_v36 }
  0x3e   :  { %3164 = vmatprep.subr.bf16.mxu0 %v3342_v37 }
  0x41   :  { %3165 = vmatpush3.bf16.msra.mxu0 %v3342_v37 }
  0x42   :  { %3075 = vmatmul.mubr.msk.bf16.gmra.mrb[28].mxu0 %vm225_vm0, %v3322_v22  ;;  %3166 = vmatprep.subr.bf16.mxu0 %v3343_v38 }
  0x43   :  { %3078 = vmatprep.mubr.msk.bf16.mxu0 %vm225_vm0, %v3323_v23 }
  0x45   :  { %3167 = vmatpush3.bf16.msra.mxu0 %v3343_v38 }
  0x46   :  { %3168 = vmatprep.subr.bf16.mxu0 %v3344_v39 }
  0x49   :  { %3169 = vmatpush3.bf16.msra.mxu0 %v3344_v39 }
  0x4a   :  { %3079 = vmatmul.mubr.msk.bf16.gmra.mrb[32].mxu0 %vm225_vm0, %v3324_v24  ;;  %3170 = vmatprep.subr.bf16.mxu0 %v3345_v40 }
  0x4b   :  { %3082 = vmatprep.mubr.msk.bf16.mxu0 %vm225_vm0, %v3325_v25 }
  0x4d   :  { %3171 = vmatpush3.bf16.msra.mxu0 %v3345_v40 }
  0x4e   :  { %3172 = vmatprep.subr.bf16.mxu0 %v3346_v41 }
  0x51   :  { %3173 = vmatpush3.bf16.msra.mxu0 %v3346_v41 }
  0x52   :  { %3083 = vmatmul.mubr.msk.bf16.gmra.mrb[36].mxu0 %vm225_vm0, %v3326_v26 }
  0x53   :  { %3086 = vmatprep.mubr.msk.bf16.mxu0 %vm225_vm0, %v3327_v27 }
  0x5a   :  { %3087 = vmatmul.mubr.msk.bf16.gmra.mrb[40].mxu0 %vm225_vm0, %v3328_v28 }
  0x5b   :  { %3090 = vmatprep.mubr.msk.bf16.mxu0 %vm225_vm0, %v3329_v29 }
  0x62   :  { %3091 = vmatmul.mubr.msk.bf16.gmra.mrb[44].mxu0 %vm225_vm0, %v3330_v31 }
  0xdd   :  { %v3048_v43 = vpop.f32.mrb[0].mxu0 }
  0xde   :  { %v341_v44 = vadd.f32 %v3048_v43, %v3778_v42  ;;  %v332_v45 = vpop.f32.mrb[1].mxu0 }
  0xdf   :  { %v333_v46 = vadd.f32 %v3778_v42, %v332_v45  ;;  %v3049_v47 = vpop.f32.mrb[2].mxu0 }
  0xe0   :  { %v573_v48 = vmul.f32 0.01, %v341_v44  ;;  %v344_v49 = vadd.f32 %v3049_v47, %v3778_v42  ;;  %v335_v50 = vpop.f32.mrb[3].mxu0  ;;  %vm525_vm1 = vcmp.gt.f32.partialorder %v341_v44, 0.0 }
  0xe1   :  { %v571_v51 = vmul.f32 0.01, %v333_v46  ;;  %v336_v52 = vadd.f32 %v3778_v42, %v335_v50  ;;  %vm523_vm3 = vcmp.gt.f32.partialorder %v333_v46, 0.0 }
  0xe2   :  { %vm526_vm2 = vcmp.gt.f32.partialorder %v344_v49, 0.0  ;;  %v574_v53 = vmul.f32 0.01, %v344_v49  ;;  %v621_v55 = vsel %vm525_vm1, %v341_v44, %v573_v48 }
  0xe3   :  { %v572_v54 = vmul.f32 0.01, %v336_v52  ;;  %vm524_vm4 = vcmp.gt.f32.partialorder %v336_v52, 0.0  ;;  %v619_v58 = vsel %vm523_vm3, %v333_v46, %v571_v51 }
  0xe4   :  { %v622_v56 = vsel %vm526_vm2, %v344_v49, %v574_v53 }
  0xe5   :  { %v3052_v57 = vpop.f32.mrb[4].mxu0  ;;  %v620_v59 = vsel %vm524_vm4, %v336_v52, %v572_v54  ;;  %v668_v60 = vpack.c.bf16 %v622_v56, %v621_v55 }
  0xe6   :  { %v357_v61 = vadd.f32 %v3052_v57, %v3778_v42  ;;  %v348_v62 = vpop.f32.mrb[5].mxu0  ;;  %v667_v63 = vpack.c.bf16 %v620_v59, %v619_v58 }
  0xe7   :  { %v349_v0 = vadd.f32 %v3778_v42, %v348_v62  ;;  %v3053_v1 = vpop.f32.mrb[6].mxu0 }
  0xe8   :  { %v577_v2 = vmul.f32 0.01, %v357_v61  ;;  %v360_v3 = vadd.f32 %v3053_v1, %v3778_v42  ;;  %v351_v4 = vpop.f32.mrb[7].mxu0  ;;  %3110 = vmatprep.mubr.bf16.mxu1 %v667_v63  ;;  %vm529_vm5 = vcmp.gt.f32.partialorder %v357_v61, 0.0 }
  0xe9   :  { %v575_v5 = vmul.f32 0.01, %v349_v0  ;;  %v352_v6 = vadd.f32 %v3778_v42, %v351_v4  ;;  %3111 = vmatmul.mubr.bf16.vlgmr.msra.gmra.mrb[0].mxu1 %v668_v60  ;;  %vm527_vm6 = vcmp.gt.f32.partialorder %v349_v0, 0.0 }
  0xea   :  { %vm530_vm7 = vcmp.gt.f32.partialorder %v360_v3, 0.0  ;;  %v578_v7 = vmul.f32 0.01, %v360_v3  ;;  %v625_v9 = vsel %vm529_vm5, %v357_v61, %v577_v2 }
  0xeb   :  { %vm528_vm8 = vcmp.gt.f32.partialorder %v352_v6, 0.0  ;;  %v576_v8 = vmul.f32 0.01, %v352_v6  ;;  %v623_v12 = vsel %vm527_vm6, %v349_v0, %v575_v5 }
  0xec   :  { %v626_v10 = vsel %vm530_vm7, %v360_v3, %v578_v7 }
  0xed   :  { %v3056_v11 = vpop.f32.mrb[8].mxu0  ;;  %v624_v13 = vsel %vm528_vm8, %v352_v6, %v576_v8  ;;  %v670_v14 = vpack.c.bf16 %v626_v10, %v625_v9 }
  0xee   :  { %v373_v15 = vadd.f32 %v3056_v11, %v3778_v42  ;;  %v364_v16 = vpop.f32.mrb[9].mxu0  ;;  %v669_v17 = vpack.c.bf16 %v624_v13, %v623_v12 }
  0xef   :  { %v365_v18 = vadd.f32 %v3778_v42, %v364_v16  ;;  %v3057_v19 = vpop.f32.mrb[10].mxu0 }
  0xf0   :  { %v581_v20 = vmul.f32 0.01, %v373_v15  ;;  %v376_v21 = vadd.f32 %v3057_v19, %v3778_v42  ;;  %v367_v22 = vpop.f32.mrb[11].mxu0  ;;  %3114 = vmatprep.mubr.bf16.mxu1 %v669_v17  ;;  %vm533_vm9 = vcmp.gt.f32.partialorder %v373_v15, 0.0 }
  0xf1   :  { %v579_v23 = vmul.f32 0.01, %v365_v18  ;;  %v368_v24 = vadd.f32 %v3778_v42, %v367_v22  ;;  %3115 = vmatmul.mubr.bf16.gmra.mrb[4].mxu1 %v670_v14  ;;  %vm531_vm10 = vcmp.gt.f32.partialorder %v365_v18, 0.0 }
  0xf2   :  { %vm534_vm11 = vcmp.gt.f32.partialorder %v376_v21, 0.0  ;;  %v582_v25 = vmul.f32 0.01, %v376_v21  ;;  %v629_v27 = vsel %vm533_vm9, %v373_v15, %v581_v20 }
  0xf3   :  { %vm532_vm12 = vcmp.gt.f32.partialorder %v368_v24, 0.0  ;;  %v580_v26 = vmul.f32 0.01, %v368_v24  ;;  %v627_v30 = vsel %vm531_vm10, %v365_v18, %v579_v23 }
  0xf4   :  { %v630_v28 = vsel %vm534_vm11, %v376_v21, %v582_v25 }
  0xf5   :  { %v3060_v29 = vpop.f32.mrb[12].mxu0  ;;  %v628_v31 = vsel %vm532_vm12, %v368_v24, %v580_v26  ;;  %v672_v32 = vpack.c.bf16 %v630_v28, %v629_v27 }
  0xf6   :  { %v389_v33 = vadd.f32 %v3060_v29, %v3778_v42  ;;  %v380_v34 = vpop.f32.mrb[13].mxu0  ;;  %v671_v35 = vpack.c.bf16 %v628_v31, %v627_v30 }
  0xf7   :  { %v381_v36 = vadd.f32 %v3778_v42, %v380_v34  ;;  %v3061_v37 = vpop.f32.mrb[14].mxu0 }
  0xf8   :  { %v585_v38 = vmul.f32 0.01, %v389_v33  ;;  %v392_v39 = vadd.f32 %v3061_v37, %v3778_v42  ;;  %v383_v40 = vpop.f32.mrb[15].mxu0  ;;  %3118 = vmatprep.mubr.bf16.mxu1 %v671_v35  ;;  %vm537_vm13 = vcmp.gt.f32.partialorder %v389_v33, 0.0 }
  0xf9   :  { %v583_v41 = vmul.f32 0.01, %v381_v36  ;;  %v384_v43 = vadd.f32 %v3778_v42, %v383_v40  ;;  %3119 = vmatmul.mubr.bf16.gmra.mrb[8].mxu1 %v672_v32  ;;  %vm535_vm14 = vcmp.gt.f32.partialorder %v381_v36, 0.0 }
  0xfa   :  { %vm538_vm15 = vcmp.gt.f32.partialorder %v392_v39, 0.0  ;;  %v586_v44 = vmul.f32 0.01, %v392_v39  ;;  %v633_v46 = vsel %vm537_vm13, %v389_v33, %v585_v38 }
  0xfb   :  { %vm536_vm0 = vcmp.gt.f32.partialorder %v384_v43, 0.0  ;;  %v584_v45 = vmul.f32 0.01, %v384_v43  ;;  %v631_v49 = vsel %vm535_vm14, %v381_v36, %v583_v41 }
  0xfc   :  { %v634_v47 = vsel %vm538_vm15, %v392_v39, %v586_v44 }
  0xfd   :  { %v3064_v48 = vpop.f32.mrb[16].mxu0  ;;  %v632_v50 = vsel %vm536_vm0, %v384_v43, %v584_v45  ;;  %v674_v51 = vpack.c.bf16 %v634_v47, %v633_v46 }
  0xfe   :  { %v405_v52 = vadd.f32 %v3064_v48, %v3778_v42  ;;  %v396_v53 = vpop.f32.mrb[17].mxu0  ;;  %v673_v54 = vpack.c.bf16 %v632_v50, %v631_v49 }
  0xff   :  { %v397_v55 = vadd.f32 %v3778_v42, %v396_v53  ;;  %v3065_v56 = vpop.f32.mrb[18].mxu0 }
 0x100   :  { %v589_v57 = vmul.f32 0.01, %v405_v52  ;;  %v408_v58 = vadd.f32 %v3065_v56, %v3778_v42  ;;  %v399_v59 = vpop.f32.mrb[19].mxu0  ;;  %3122 = vmatprep.mubr.bf16.mxu1 %v673_v54  ;;  %vm541_vm1 = vcmp.gt.f32.partialorder %v405_v52, 0.0 }
 0x101   :  { %v587_v60 = vmul.f32 0.01, %v397_v55  ;;  %v400_v61 = vadd.f32 %v3778_v42, %v399_v59  ;;  %3123 = vmatmul.mubr.bf16.gmra.mrb[12].mxu1 %v674_v51  ;;  %vm539_vm2 = vcmp.gt.f32.partialorder %v397_v55, 0.0 }
 0x102   :  { %vm542_vm3 = vcmp.gt.f32.partialorder %v408_v58, 0.0  ;;  %v590_v62 = vmul.f32 0.01, %v408_v58  ;;  %v637_v0 = vsel %vm541_vm1, %v405_v52, %v589_v57 }
 0x103   :  { %vm540_vm4 = vcmp.gt.f32.partialorder %v400_v61, 0.0  ;;  %v588_v63 = vmul.f32 0.01, %v400_v61  ;;  %v635_v3 = vsel %vm539_vm2, %v397_v55, %v587_v60 }
 0x104   :  { %v638_v1 = vsel %vm542_vm3, %v408_v58, %v590_v62 }
 0x105   :  { %v3068_v2 = vpop.f32.mrb[20].mxu0  ;;  %v636_v4 = vsel %vm540_vm4, %v400_v61, %v588_v63  ;;  %v676_v5 = vpack.c.bf16 %v638_v1, %v637_v0 }
 0x106   :  { %v421_v6 = vadd.f32 %v3068_v2, %v3778_v42  ;;  %v412_v7 = vpop.f32.mrb[21].mxu0  ;;  %v675_v8 = vpack.c.bf16 %v636_v4, %v635_v3 }
 0x107   :  { %v413_v9 = vadd.f32 %v3778_v42, %v412_v7  ;;  %v3069_v10 = vpop.f32.mrb[22].mxu0 }
 0x108   :  { %v593_v11 = vmul.f32 0.01, %v421_v6  ;;  %v424_v12 = vadd.f32 %v3069_v10, %v3778_v42  ;;  %v415_v13 = vpop.f32.mrb[23].mxu0  ;;  %3126 = vmatprep.mubr.bf16.mxu1 %v675_v8  ;;  %vm545_vm5 = vcmp.gt.f32.partialorder %v421_v6, 0.0 }
 0x109   :  { %v591_v14 = vmul.f32 0.01, %v413_v9  ;;  %v416_v15 = vadd.f32 %v3778_v42, %v415_v13  ;;  %3127 = vmatmul.mubr.bf16.gmra.mrb[16].mxu1 %v676_v5  ;;  %vm543_vm6 = vcmp.gt.f32.partialorder %v413_v9, 0.0 }
 0x10a   :  { %vm546_vm7 = vcmp.gt.f32.partialorder %v424_v12, 0.0  ;;  %v594_v16 = vmul.f32 0.01, %v424_v12  ;;  %v641_v18 = vsel %vm545_vm5, %v421_v6, %v593_v11 }
 0x10b   :  { %vm544_vm8 = vcmp.gt.f32.partialorder %v416_v15, 0.0  ;;  %v592_v17 = vmul.f32 0.01, %v416_v15  ;;  %v639_v21 = vsel %vm543_vm6, %v413_v9, %v591_v14 }
 0x10c   :  { %v642_v19 = vsel %vm546_vm7, %v424_v12, %v594_v16 }
 0x10d   :  { %v3072_v20 = vpop.f32.mrb[24].mxu0  ;;  %v640_v22 = vsel %vm544_vm8, %v416_v15, %v592_v17  ;;  %v678_v23 = vpack.c.bf16 %v642_v19, %v641_v18 }
 0x10e   :  { %v437_v24 = vadd.f32 %v3072_v20, %v3778_v42  ;;  %v428_v25 = vpop.f32.mrb[25].mxu0  ;;  %v677_v26 = vpack.c.bf16 %v640_v22, %v639_v21 }
 0x10f   :  { %v429_v27 = vadd.f32 %v3778_v42, %v428_v25  ;;  %v3073_v28 = vpop.f32.mrb[26].mxu0 }
 0x110   :  { %v597_v29 = vmul.f32 0.01, %v437_v24  ;;  %v440_v30 = vadd.f32 %v3073_v28, %v3778_v42  ;;  %v431_v31 = vpop.f32.mrb[27].mxu0  ;;  %3130 = vmatprep.mubr.bf16.mxu1 %v677_v26  ;;  %vm549_vm9 = vcmp.gt.f32.partialorder %v437_v24, 0.0 }
 0x111   :  { %v595_v32 = vmul.f32 0.01, %v429_v27  ;;  %v432_v33 = vadd.f32 %v3778_v42, %v431_v31  ;;  %3131 = vmatmul.mubr.bf16.gmra.mrb[20].mxu1 %v678_v23  ;;  %vm547_vm10 = vcmp.gt.f32.partialorder %v429_v27, 0.0 }
 0x112   :  { %vm550_vm11 = vcmp.gt.f32.partialorder %v440_v30, 0.0  ;;  %v598_v34 = vmul.f32 0.01, %v440_v30  ;;  %v645_v36 = vsel %vm549_vm9, %v437_v24, %v597_v29 }
 0x113   :  { %vm548_vm12 = vcmp.gt.f32.partialorder %v432_v33, 0.0  ;;  %v596_v35 = vmul.f32 0.01, %v432_v33  ;;  %v643_v39 = vsel %vm547_vm10, %v429_v27, %v595_v32 }
 0x114   :  { %v646_v37 = vsel %vm550_vm11, %v440_v30, %v598_v34 }
 0x115   :  { %v3076_v38 = vpop.f32.mrb[28].mxu0  ;;  %v644_v40 = vsel %vm548_vm12, %v432_v33, %v596_v35  ;;  %v680_v41 = vpack.c.bf16 %v646_v37, %v645_v36 }
 0x116   :  { %v453_v43 = vadd.f32 %v3076_v38, %v3778_v42  ;;  %v444_v44 = vpop.f32.mrb[29].mxu0  ;;  %v679_v45 = vpack.c.bf16 %v644_v40, %v643_v39 }
 0x117   :  { %v445_v46 = vadd.f32 %v3778_v42, %v444_v44  ;;  %v3077_v47 = vpop.f32.mrb[30].mxu0 }
 0x118   :  { %v601_v48 = vmul.f32 0.01, %v453_v43  ;;  %v456_v49 = vadd.f32 %v3077_v47, %v3778_v42  ;;  %v447_v50 = vpop.f32.mrb[31].mxu0  ;;  %3134 = vmatprep.mubr.bf16.mxu1 %v679_v45  ;;  %vm553_vm13 = vcmp.gt.f32.partialorder %v453_v43, 0.0 }
 0x119   :  { %v599_v51 = vmul.f32 0.01, %v445_v46  ;;  %v448_v52 = vadd.f32 %v3778_v42, %v447_v50  ;;  %3135 = vmatmul.mubr.bf16.gmra.mrb[24].mxu1 %v680_v41  ;;  %vm551_vm14 = vcmp.gt.f32.partialorder %v445_v46, 0.0 }
 0x11a   :  { %vm554_vm15 = vcmp.gt.f32.partialorder %v456_v49, 0.0  ;;  %v602_v53 = vmul.f32 0.01, %v456_v49  ;;  %v649_v55 = vsel %vm553_vm13, %v453_v43, %v601_v48 }
 0x11b   :  { %vm552_vm0 = vcmp.gt.f32.partialorder %v448_v52, 0.0  ;;  %v600_v54 = vmul.f32 0.01, %v448_v52  ;;  %v647_v58 = vsel %vm551_vm14, %v445_v46, %v599_v51 }
 0x11c   :  { %v650_v56 = vsel %vm554_vm15, %v456_v49, %v602_v53 }
 0x11d   :  { %v3080_v57 = vpop.f32.mrb[32].mxu0  ;;  %v648_v59 = vsel %vm552_vm0, %v448_v52, %v600_v54  ;;  %v682_v60 = vpack.c.bf16 %v650_v56, %v649_v55 }
 0x11e   :  { %v469_v61 = vadd.f32 %v3080_v57, %v3778_v42  ;;  %v460_v62 = vpop.f32.mrb[33].mxu0  ;;  %v681_v63 = vpack.c.bf16 %v648_v59, %v647_v58 }
 0x11f   :  { %v461_v0 = vadd.f32 %v3778_v42, %v460_v62  ;;  %v3081_v1 = vpop.f32.mrb[34].mxu0 }
 0x120   :  { %v605_v2 = vmul.f32 0.01, %v469_v61  ;;  %v472_v3 = vadd.f32 %v3081_v1, %v3778_v42  ;;  %v463_v4 = vpop.f32.mrb[35].mxu0  ;;  %3138 = vmatprep.mubr.bf16.mxu1 %v681_v63  ;;  %vm557_vm1 = vcmp.gt.f32.partialorder %v469_v61, 0.0 }
 0x121   :  { %v603_v5 = vmul.f32 0.01, %v461_v0  ;;  %v464_v6 = vadd.f32 %v3778_v42, %v463_v4  ;;  %3139 = vmatmul.mubr.bf16.gmra.mrb[28].mxu1 %v682_v60  ;;  %vm555_vm2 = vcmp.gt.f32.partialorder %v461_v0, 0.0 }
 0x122   :  { %vm558_vm3 = vcmp.gt.f32.partialorder %v472_v3, 0.0  ;;  %v606_v7 = vmul.f32 0.01, %v472_v3  ;;  %v653_v9 = vsel %vm557_vm1, %v469_v61, %v605_v2 }
 0x123   :  { %vm556_vm4 = vcmp.gt.f32.partialorder %v464_v6, 0.0  ;;  %v604_v8 = vmul.f32 0.01, %v464_v6  ;;  %v651_v12 = vsel %vm555_vm2, %v461_v0, %v603_v5 }
 0x124   :  { %v654_v10 = vsel %vm558_vm3, %v472_v3, %v606_v7  ;;  %v3840_v7 = vld [vmem:[%s4526_s7 + $0x10] sm:$0xff]  }
 0x125   :  { %v3084_v11 = vpop.f32.mrb[36].mxu0  ;;  %v652_v13 = vsel %vm556_vm4, %v464_v6, %v604_v8  ;;  %v684_v14 = vpack.c.bf16 %v654_v10, %v653_v9  ;;  %v3347_v6 = vld [vmem:[%s4526_s7] sm:$0xff]   ;;  %v3847_v8 = vld [vmem:[%s4526_s7 + $0x18] sm:$0xff]   ;;  %v3861_v10 = vld [vmem:[%s4526_s7 + $0x28] sm:$0xff]  }
 0x126   :  { %v485_v15 = vadd.f32 %v3084_v11, %v3778_v42  ;;  %v476_v16 = vpop.f32.mrb[37].mxu0  ;;  %v683_v17 = vpack.c.bf16 %v652_v13, %v651_v12  ;;  %3286 = vmatprep.subr.bf16.mxu1 %v3347_v6  ;;  %3222 = vmatprep.subr.bf16.mxu0 %v3347_v6  ;;  %v3854_v9 = vld [vmem:[%s4526_s7 + $0x20] sm:$0xff]   ;;  %v3868_v11 = vld [vmem:[%s4526_s7 + $0x30] sm:$0xff]  }
 0x127   :  { %v477_v18 = vadd.f32 %v3778_v42, %v476_v16  ;;  %v3085_v19 = vpop.f32.mrb[38].mxu0  ;;  %3294 = vmatpush3.bf16.msra.mxu1 %v3347_v6  ;;  %v3875_v12 = vld [vmem:[%s4523_s4] ss:$0 sm:$0xff] }
 0x128   :  { %v609_v20 = vmul.f32 0.01, %v485_v15  ;;  %v488_v21 = vadd.f32 %v3085_v19, %v3778_v42  ;;  %v479_v22 = vpop.f32.mrb[39].mxu0  ;;  %3142 = vmatprep.mubr.bf16.mxu1 %v683_v17  ;;  %vm561_vm5 = vcmp.gt.f32.partialorder %v485_v15, 0.0 }
 0x129   :  { %v607_v23 = vmul.f32 0.01, %v477_v18  ;;  %v480_v24 = vadd.f32 %v3778_v42, %v479_v22  ;;  %3143 = vmatmul.mubr.bf16.gmra.mrb[32].mxu1 %v684_v14  ;;  %vm559_vm6 = vcmp.gt.f32.partialorder %v477_v18, 0.0 }
 0x12a   :  { %vm562_vm7 = vcmp.gt.f32.partialorder %v488_v21, 0.0  ;;  %v610_v25 = vmul.f32 0.01, %v488_v21  ;;  %v657_v27 = vsel %vm561_vm5, %v485_v15, %v609_v20 }
 0x12b   :  { %vm560_vm8 = vcmp.gt.f32.partialorder %v480_v24, 0.0  ;;  %v608_v26 = vmul.f32 0.01, %v480_v24  ;;  %v655_v30 = vsel %vm559_vm6, %v477_v18, %v607_v23 }
 0x12c   :  { %v658_v28 = vsel %vm562_vm7, %v488_v21, %v610_v25 }
 0x12d   :  { %v3088_v29 = vpop.f32.mrb[40].mxu0  ;;  %v656_v31 = vsel %vm560_vm8, %v480_v24, %v608_v26  ;;  %v686_v32 = vpack.c.bf16 %v658_v28, %v657_v27 }
 0x12e   :  { %v501_v33 = vadd.f32 %v3088_v29, %v3778_v42  ;;  %v492_v34 = vpop.f32.mrb[41].mxu0  ;;  %v685_v35 = vpack.c.bf16 %v656_v31, %v655_v30 }
 0x12f   :  { %v493_v36 = vadd.f32 %v3778_v42, %v492_v34  ;;  %v3089_v37 = vpop.f32.mrb[42].mxu0 }
 0x130   :  { %v613_v38 = vmul.f32 0.01, %v501_v33  ;;  %v504_v39 = vadd.f32 %v3089_v37, %v3778_v42  ;;  %v495_v40 = vpop.f32.mrb[43].mxu0  ;;  %3146 = vmatprep.mubr.bf16.mxu1 %v685_v35  ;;  %vm565_vm9 = vcmp.gt.f32.partialorder %v501_v33, 0.0 }
 0x131   :  { %v611_v41 = vmul.f32 0.01, %v493_v36  ;;  %v496_v43 = vadd.f32 %v3778_v42, %v495_v40  ;;  %3147 = vmatmul.mubr.bf16.gmra.mrb[36].mxu1 %v686_v32  ;;  %vm563_vm10 = vcmp.gt.f32.partialorder %v493_v36, 0.0 }
 0x132   :  { %vm566_vm11 = vcmp.gt.f32.partialorder %v504_v39, 0.0  ;;  %v614_v44 = vmul.f32 0.01, %v504_v39  ;;  %v661_v46 = vsel %vm565_vm9, %v501_v33, %v613_v38 }
 0x133   :  { %vm564_vm12 = vcmp.gt.f32.partialorder %v496_v43, 0.0  ;;  %v612_v45 = vmul.f32 0.01, %v496_v43  ;;  %v659_v49 = vsel %vm563_vm10, %v493_v36, %v611_v41 }
 0x134   :  { %v662_v47 = vsel %vm566_vm11, %v504_v39, %v614_v44 }
 0x135   :  { %v3092_v48 = vpop.f32.mrb[44].mxu0  ;;  %v660_v50 = vsel %vm564_vm12, %v496_v43, %v612_v45  ;;  %v688_v51 = vpack.c.bf16 %v662_v47, %v661_v46 }
 0x136   :  { %v517_v52 = vadd.f32 %v3092_v48, %v3778_v42  ;;  %v508_v53 = vpop.f32.mrb[45].mxu0  ;;  %v687_v54 = vpack.c.bf16 %v660_v50, %v659_v49 }
 0x137   :  { %v509_v55 = vadd.f32 %v3778_v42, %v508_v53  ;;  %v3093_v56 = vpop.f32.mrb[46].mxu0 }
 0x138   :  { %v617_v57 = vmul.f32 0.01, %v517_v52  ;;  %v520_v58 = vadd.f32 %v3093_v56, %v3778_v42  ;;  %v511_v59 = vpop.f32.mrb[47].mxu0  ;;  %3150 = vmatprep.mubr.bf16.mxu1 %v687_v54  ;;  %vm569_vm13 = vcmp.gt.f32.partialorder %v517_v52, 0.0 }
 0x139   :  { %v615_v60 = vmul.f32 0.01, %v509_v55  ;;  %v512_v61 = vadd.f32 %v3778_v42, %v511_v59  ;;  %3151 = vmatmul.mubr.bf16.gmra.mrb[40].mxu1 %v688_v51  ;;  %vm567_vm14 = vcmp.gt.f32.partialorder %v509_v55, 0.0  ;;  %v3834_v42 = vld [vmem:[%s4526_s7 + $0x8] sm:$0xff]  }
 0x13a   :  { %vm570_vm15 = vcmp.gt.f32.partialorder %v520_v58, 0.0  ;;  %v618_v62 = vmul.f32 0.01, %v520_v58  ;;  %v665_v0 = vsel %vm569_vm13, %v517_v52, %v617_v57  ;;  %3287 = vmatprep.subr.bf16.mxu1 %v3834_v42 }
 0x13b   :  { %vm568_vm0 = vcmp.gt.f32.partialorder %v512_v61, 0.0  ;;  %v616_v63 = vmul.f32 0.01, %v512_v61  ;;  %v663_v2 = vsel %vm567_vm14, %v509_v55, %v615_v60  ;;  %3295 = vmatpush3.bf16.msra.mxu1 %v3834_v42 }
 0x13c   :  { %v666_v1 = vsel %vm570_vm15, %v520_v58, %v618_v62  ;;  %3288 = vmatprep.subr.bf16.mxu1 %v3840_v7 }
 0x13d   :  { %v664_v3 = vsel %vm568_vm0, %v512_v61, %v616_v63  ;;  %v690_v4 = vpack.c.bf16 %v666_v1, %v665_v0 }
 0x13e   :  { %v689_v5 = vpack.c.bf16 %v664_v3, %v663_v2 }
 0x13f   :  { %3296 = vmatpush3.bf16.msra.mxu1 %v3840_v7 }
 0x140   :  { %3154 = vmatprep.mubr.bf16.mxu1 %v689_v5  ;;  %3289 = vmatprep.subr.bf16.mxu1 %v3847_v8 }
 0x141   :  { %3155 = vmatmul.mubr.bf16.gmra.mrb[44].mxu1 %v690_v4 }
 0x143   :  { %3297 = vmatpush3.bf16.msra.mxu1 %v3847_v8 }
 0x144   :  { %3290 = vmatprep.subr.bf16.mxu1 %v3854_v9 }
 0x147   :  { %3298 = vmatpush3.bf16.msra.mxu1 %v3854_v9 }
 0x148   :  { %3291 = vmatprep.subr.bf16.mxu1 %v3861_v10 }
 0x14b   :  { %3299 = vmatpush3.bf16.msra.mxu1 %v3861_v10 }
 0x14c   :  { %3292 = vmatprep.subr.bf16.mxu1 %v3868_v11 }
 0x14f   :  { %3300 = vmatpush3.bf16.msra.mxu1 %v3868_v11 }
 0x1bc   :  { %v3112_v13 = vpop.f32.mrb[0].mxu1 }
 0x1bd   :  { %v805_v14 = vadd.f32 %v3112_v13, %v3875_v12  ;;  %v796_v15 = vpop.f32.mrb[1].mxu1 }
 0x1be   :  { %v797_v16 = vadd.f32 %v3875_v12, %v796_v15  ;;  %v3113_v17 = vpop.f32.mrb[2].mxu1 }
 0x1bf   :  { %v1037_v18 = vmul.f32 0.01, %v805_v14  ;;  %v808_v19 = vadd.f32 %v3113_v17, %v3875_v12  ;;  %v799_v20 = vpop.f32.mrb[3].mxu1  ;;  %vm989_vm1 = vcmp.gt.f32.partialorder %v805_v14, 0.0 }
 0x1c0   :  { %v1035_v21 = vmul.f32 0.01, %v797_v16  ;;  %v800_v22 = vadd.f32 %v3875_v12, %v799_v20  ;;  %vm987_vm2 = vcmp.gt.f32.partialorder %v797_v16, 0.0 }
 0x1c1   :  { %vm990_vm3 = vcmp.gt.f32.partialorder %v808_v19, 0.0  ;;  %v1038_v23 = vmul.f32 0.01, %v808_v19  ;;  %v1085_v25 = vsel %vm989_vm1, %v805_v14, %v1037_v18 }
 0x1c2   :  { %vm988_vm4 = vcmp.gt.f32.partialorder %v800_v22, 0.0  ;;  %v1036_v24 = vmul.f32 0.01, %v800_v22  ;;  %v1083_v29 = vsel %vm987_vm2, %v797_v16, %v1035_v21 }
 0x1c3   :  { %v1086_v26 = vsel %vm990_vm3, %v808_v19, %v1038_v23 }
 0x1c4   :  { %v1132_v27 = vpack.c.bf16 %v1086_v26, %v1085_v25  ;;  %v3116_v28 = vpop.f32.mrb[4].mxu1  ;;  %v1084_v30 = vsel %vm988_vm4, %v800_v22, %v1036_v24 }
 0x1c5   :  { %v821_v31 = vadd.f32 %v3116_v28, %v3875_v12  ;;  %v812_v32 = vpop.f32.mrb[5].mxu1  ;;  %v1131_v33 = vpack.c.bf16 %v1084_v30, %v1083_v29 }
 0x1c6   :  { %v813_v34 = vadd.f32 %v3875_v12, %v812_v32  ;;  %v3117_v35 = vpop.f32.mrb[6].mxu1 }
 0x1c7   :  { %v1041_v36 = vmul.f32 0.01, %v821_v31  ;;  %v824_v37 = vadd.f32 %v3117_v35, %v3875_v12  ;;  %v815_v38 = vpop.f32.mrb[7].mxu1  ;;  %3174 = vmatprep.mubr.bf16.mxu0 %v1131_v33  ;;  %vm993_vm5 = vcmp.gt.f32.partialorder %v821_v31, 0.0 }
 0x1c8   :  { %v1039_v39 = vmul.f32 0.01, %v813_v34  ;;  %v816_v40 = vadd.f32 %v3875_v12, %v815_v38  ;;  %3175 = vmatmul.mubr.bf16.vlgmr.msra.gmra.mrb[48].mxu0 %v1132_v27  ;;  %vm991_vm6 = vcmp.gt.f32.partialorder %v813_v34, 0.0 }
 0x1c9   :  { %vm994_vm7 = vcmp.gt.f32.partialorder %v824_v37, 0.0  ;;  %v1042_v41 = vmul.f32 0.01, %v824_v37  ;;  %3223 = vmatpush3.bf16.msra.mxu0 %v3347_v6  ;;  %v1089_v44 = vsel %vm993_vm5, %v821_v31, %v1041_v36 }
 0x1ca   :  { %vm992_vm8 = vcmp.gt.f32.partialorder %v816_v40, 0.0  ;;  %v1040_v43 = vmul.f32 0.01, %v816_v40  ;;  %3224 = vmatprep.subr.bf16.mxu0 %v3834_v42  ;;  %v1087_v47 = vsel %vm991_vm6, %v813_v34, %v1039_v39 }
 0x1cb   :  { %v1090_v45 = vsel %vm994_vm7, %v824_v37, %v1042_v41 }
 0x1cc   :  { %v3120_v46 = vpop.f32.mrb[8].mxu1  ;;  %v1088_v48 = vsel %vm992_vm8, %v816_v40, %v1040_v43  ;;  %v1134_v49 = vpack.c.bf16 %v1090_v45, %v1089_v44 }
 0x1cd   :  { %v837_v50 = vadd.f32 %v3120_v46, %v3875_v12  ;;  %v828_v51 = vpop.f32.mrb[9].mxu1  ;;  %v1133_v52 = vpack.c.bf16 %v1088_v48, %v1087_v47  ;;  %3225 = vmatpush3.bf16.msra.mxu0 %v3834_v42 }
 0x1ce   :  { %v829_v53 = vadd.f32 %v3875_v12, %v828_v51  ;;  %v3121_v54 = vpop.f32.mrb[10].mxu1  ;;  %3226 = vmatprep.subr.bf16.mxu0 %v3840_v7 }
 0x1cf   :  { %v1045_v55 = vmul.f32 0.01, %v837_v50  ;;  %v840_v56 = vadd.f32 %v3121_v54, %v3875_v12  ;;  %v831_v57 = vpop.f32.mrb[11].mxu1  ;;  %3178 = vmatprep.mubr.bf16.mxu0 %v1133_v52  ;;  %vm997_vm9 = vcmp.gt.f32.partialorder %v837_v50, 0.0 }
 0x1d0   :  { %v1043_v58 = vmul.f32 0.01, %v829_v53  ;;  %v832_v59 = vadd.f32 %v3875_v12, %v831_v57  ;;  %3179 = vmatmul.mubr.bf16.gmra.mrb[52].mxu0 %v1134_v49  ;;  %vm995_vm10 = vcmp.gt.f32.partialorder %v829_v53, 0.0 }
 0x1d1   :  { %vm998_vm11 = vcmp.gt.f32.partialorder %v840_v56, 0.0  ;;  %v1046_v60 = vmul.f32 0.01, %v840_v56  ;;  %3227 = vmatpush3.bf16.msra.mxu0 %v3840_v7  ;;  %v1093_v62 = vsel %vm997_vm9, %v837_v50, %v1045_v55 }
 0x1d2   :  { %vm996_vm12 = vcmp.gt.f32.partialorder %v832_v59, 0.0  ;;  %v1044_v61 = vmul.f32 0.01, %v832_v59  ;;  %3228 = vmatprep.subr.bf16.mxu0 %v3847_v8  ;;  %v1091_v1 = vsel %vm995_vm10, %v829_v53, %v1043_v58 }
 0x1d3   :  { %v1094_v63 = vsel %vm998_vm11, %v840_v56, %v1046_v60 }
 0x1d4   :  { %v3124_v0 = vpop.f32.mrb[12].mxu1  ;;  %v1092_v2 = vsel %vm996_vm12, %v832_v59, %v1044_v61  ;;  %v1136_v3 = vpack.c.bf16 %v1094_v63, %v1093_v62 }
 0x1d5   :  { %v853_v4 = vadd.f32 %v3124_v0, %v3875_v12  ;;  %v844_v5 = vpop.f32.mrb[13].mxu1  ;;  %v1135_v6 = vpack.c.bf16 %v1092_v2, %v1091_v1  ;;  %3229 = vmatpush3.bf16.msra.mxu0 %v3847_v8 }
 0x1d6   :  { %v845_v42 = vadd.f32 %v3875_v12, %v844_v5  ;;  %v3125_v13 = vpop.f32.mrb[14].mxu1  ;;  %3230 = vmatprep.subr.bf16.mxu0 %v3854_v9 }
 0x1d7   :  { %v1049_v7 = vmul.f32 0.01, %v853_v4  ;;  %v856_v14 = vadd.f32 %v3125_v13, %v3875_v12  ;;  %v847_v15 = vpop.f32.mrb[15].mxu1  ;;  %3182 = vmatprep.mubr.bf16.mxu0 %v1135_v6  ;;  %vm1001_vm13 = vcmp.gt.f32.partialorder %v853_v4, 0.0 }
 0x1d8   :  { %v1047_v16 = vmul.f32 0.01, %v845_v42  ;;  %v848_v17 = vadd.f32 %v3875_v12, %v847_v15  ;;  %3183 = vmatmul.mubr.bf16.gmra.mrb[56].mxu0 %v1136_v3  ;;  %vm999_vm14 = vcmp.gt.f32.partialorder %v845_v42, 0.0 }
 0x1d9   :  { %vm1002_vm15 = vcmp.gt.f32.partialorder %v856_v14, 0.0  ;;  %v1050_v18 = vmul.f32 0.01, %v856_v14  ;;  %3231 = vmatpush3.bf16.msra.mxu0 %v3854_v9  ;;  %v1097_v19 = vsel %vm1001_vm13, %v853_v4, %v1049_v7 }
 0x1da   :  { %vm1000_vm0 = vcmp.gt.f32.partialorder %v848_v17, 0.0  ;;  %v1048_v8 = vmul.f32 0.01, %v848_v17  ;;  %3232 = vmatprep.subr.bf16.mxu0 %v3861_v10  ;;  %v1095_v22 = vsel %vm999_vm14, %v845_v42, %v1047_v16 }
 0x1db   :  { %v1098_v20 = vsel %vm1002_vm15, %v856_v14, %v1050_v18 }
 0x1dc   :  { %v3128_v21 = vpop.f32.mrb[16].mxu1  ;;  %v1096_v23 = vsel %vm1000_vm0, %v848_v17, %v1048_v8  ;;  %v1138_v24 = vpack.c.bf16 %v1098_v20, %v1097_v19 }
 0x1dd   :  { %v869_v25 = vadd.f32 %v3128_v21, %v3875_v12  ;;  %v860_v26 = vpop.f32.mrb[17].mxu1  ;;  %v1137_v27 = vpack.c.bf16 %v1096_v23, %v1095_v22  ;;  %3233 = vmatpush3.bf16.msra.mxu0 %v3861_v10 }
 0x1de   :  { %v861_v28 = vadd.f32 %v3875_v12, %v860_v26  ;;  %v3129_v29 = vpop.f32.mrb[18].mxu1  ;;  %3234 = vmatprep.subr.bf16.mxu0 %v3868_v11 }
 0x1df   :  { %v1053_v9 = vmul.f32 0.01, %v869_v25  ;;  %v872_v30 = vadd.f32 %v3129_v29, %v3875_v12  ;;  %v863_v31 = vpop.f32.mrb[19].mxu1  ;;  %3186 = vmatprep.mubr.bf16.mxu0 %v1137_v27  ;;  %vm1005_vm1 = vcmp.gt.f32.partialorder %v869_v25, 0.0 }
 0x1e0   :  { %v1051_v32 = vmul.f32 0.01, %v861_v28  ;;  %v864_v33 = vadd.f32 %v3875_v12, %v863_v31  ;;  %3187 = vmatmul.mubr.bf16.gmra.mrb[60].mxu0 %v1138_v24  ;;  %vm1003_vm2 = vcmp.gt.f32.partialorder %v861_v28, 0.0 }
 0x1e1   :  { %vm1006_vm3 = vcmp.gt.f32.partialorder %v872_v30, 0.0  ;;  %v1054_v34 = vmul.f32 0.01, %v872_v30  ;;  %3235 = vmatpush3.bf16.msra.mxu0 %v3868_v11  ;;  %v1101_v35 = vsel %vm1005_vm1, %v869_v25, %v1053_v9 }
 0x1e2   :  { %vm1004_vm4 = vcmp.gt.f32.partialorder %v864_v33, 0.0  ;;  %v1052_v10 = vmul.f32 0.01, %v864_v33  ;;  %v1099_v38 = vsel %vm1003_vm2, %v861_v28, %v1051_v32 }
 0x1e3   :  { %v1102_v36 = vsel %vm1006_vm3, %v872_v30, %v1054_v34 }
 0x1e4   :  { %v3132_v37 = vpop.f32.mrb[20].mxu1  ;;  %v1100_v39 = vsel %vm1004_vm4, %v864_v33, %v1052_v10  ;;  %v1140_v40 = vpack.c.bf16 %v1102_v36, %v1101_v35 }
 0x1e5   :  { %v885_v41 = vadd.f32 %v3132_v37, %v3875_v12  ;;  %v876_v43 = vpop.f32.mrb[21].mxu1  ;;  %v1139_v44 = vpack.c.bf16 %v1100_v39, %v1099_v38 }
 0x1e6   :  { %v877_v45 = vadd.f32 %v3875_v12, %v876_v43  ;;  %v3133_v46 = vpop.f32.mrb[22].mxu1 }
 0x1e7   :  { %v1057_v47 = vmul.f32 0.01, %v885_v41  ;;  %v888_v48 = vadd.f32 %v3133_v46, %v3875_v12  ;;  %v879_v49 = vpop.f32.mrb[23].mxu1  ;;  %3190 = vmatprep.mubr.bf16.mxu0 %v1139_v44  ;;  %vm1009_vm5 = vcmp.gt.f32.partialorder %v885_v41, 0.0 }
 0x1e8   :  { %v1055_v11 = vmul.f32 0.01, %v877_v45  ;;  %v880_v50 = vadd.f32 %v3875_v12, %v879_v49  ;;  %3191 = vmatmul.mubr.bf16.gmra.mrb[64].mxu0 %v1140_v40  ;;  %vm1007_vm6 = vcmp.gt.f32.partialorder %v877_v45, 0.0 }
 0x1e9   :  { %vm1010_vm7 = vcmp.gt.f32.partialorder %v888_v48, 0.0  ;;  %v1058_v51 = vmul.f32 0.01, %v888_v48  ;;  %v1105_v53 = vsel %vm1009_vm5, %v885_v41, %v1057_v47 }
 0x1ea   :  { %vm1008_vm8 = vcmp.gt.f32.partialorder %v880_v50, 0.0  ;;  %v1056_v52 = vmul.f32 0.01, %v880_v50  ;;  %v1103_v56 = vsel %vm1007_vm6, %v877_v45, %v1055_v11 }
 0x1eb   :  { %v1106_v54 = vsel %vm1010_vm7, %v888_v48, %v1058_v51 }
 0x1ec   :  { %v3136_v55 = vpop.f32.mrb[24].mxu1  ;;  %v1104_v57 = vsel %vm1008_vm8, %v880_v50, %v1056_v52  ;;  %v1142_v58 = vpack.c.bf16 %v1106_v54, %v1105_v53 }
 0x1ed   :  { %v901_v59 = vadd.f32 %v3136_v55, %v3875_v12  ;;  %v892_v60 = vpop.f32.mrb[25].mxu1  ;;  %v1141_v61 = vpack.c.bf16 %v1104_v57, %v1103_v56 }
 0x1ee   :  { %v893_v62 = vadd.f32 %v3875_v12, %v892_v60  ;;  %v3137_v63 = vpop.f32.mrb[26].mxu1 }
 0x1ef   :  { %v1061_v0 = vmul.f32 0.01, %v901_v59  ;;  %v904_v1 = vadd.f32 %v3137_v63, %v3875_v12  ;;  %v895_v2 = vpop.f32.mrb[27].mxu1  ;;  %3194 = vmatprep.mubr.bf16.mxu0 %v1141_v61  ;;  %vm1013_vm9 = vcmp.gt.f32.partialorder %v901_v59, 0.0 }
 0x1f0   :  { %v1059_v3 = vmul.f32 0.01, %v893_v62  ;;  %v896_v4 = vadd.f32 %v3875_v12, %v895_v2  ;;  %3195 = vmatmul.mubr.bf16.gmra.mrb[68].mxu0 %v1142_v58  ;;  %vm1011_vm10 = vcmp.gt.f32.partialorder %v893_v62, 0.0 }
 0x1f1   :  { %vm1014_vm11 = vcmp.gt.f32.partialorder %v904_v1, 0.0  ;;  %v1062_v5 = vmul.f32 0.01, %v904_v1  ;;  %v1109_v42 = vsel %vm1013_vm9, %v901_v59, %v1061_v0 }
 0x1f2   :  { %vm1012_vm12 = vcmp.gt.f32.partialorder %v896_v4, 0.0  ;;  %v1060_v6 = vmul.f32 0.01, %v896_v4  ;;  %v1107_v14 = vsel %vm1011_vm10, %v893_v62, %v1059_v3 }
 0x1f3   :  { %v1110_v13 = vsel %vm1014_vm11, %v904_v1, %v1062_v5 }
 0x1f4   :  { %v3140_v7 = vpop.f32.mrb[28].mxu1  ;;  %v1108_v15 = vsel %vm1012_vm12, %v896_v4, %v1060_v6  ;;  %v1144_v16 = vpack.c.bf16 %v1110_v13, %v1109_v42 }
 0x1f5   :  { %v917_v17 = vadd.f32 %v3140_v7, %v3875_v12  ;;  %v908_v18 = vpop.f32.mrb[29].mxu1  ;;  %v1143_v8 = vpack.c.bf16 %v1108_v15, %v1107_v14 }
 0x1f6   :  { %v909_v19 = vadd.f32 %v3875_v12, %v908_v18  ;;  %v3141_v20 = vpop.f32.mrb[30].mxu1 }
 0x1f7   :  { %v1065_v21 = vmul.f32 0.01, %v917_v17  ;;  %v920_v22 = vadd.f32 %v3141_v20, %v3875_v12  ;;  %v911_v23 = vpop.f32.mrb[31].mxu1  ;;  %3198 = vmatprep.mubr.bf16.mxu0 %v1143_v8  ;;  %vm1017_vm13 = vcmp.gt.f32.partialorder %v917_v17, 0.0 }
 0x1f8   :  { %v1063_v24 = vmul.f32 0.01, %v909_v19  ;;  %v912_v25 = vadd.f32 %v3875_v12, %v911_v23  ;;  %3199 = vmatmul.mubr.bf16.gmra.mrb[72].mxu0 %v1144_v16  ;;  %vm1015_vm14 = vcmp.gt.f32.partialorder %v909_v19, 0.0 }
 0x1f9   :  { %vm1018_vm15 = vcmp.gt.f32.partialorder %v920_v22, 0.0  ;;  %v1066_v26 = vmul.f32 0.01, %v920_v22  ;;  %v1113_v28 = vsel %vm1017_vm13, %v917_v17, %v1065_v21 }
 0x1fa   :  { %vm1016_vm0 = vcmp.gt.f32.partialorder %v912_v25, 0.0  ;;  %v1064_v27 = vmul.f32 0.01, %v912_v25  ;;  %v1111_v30 = vsel %vm1015_vm14, %v909_v19, %v1063_v24 }
 0x1fb   :  { %v1114_v29 = vsel %vm1018_vm15, %v920_v22, %v1066_v26 }
 0x1fc   :  { %v3144_v9 = vpop.f32.mrb[32].mxu1  ;;  %v1112_v31 = vsel %vm1016_vm0, %v912_v25, %v1064_v27  ;;  %v1146_v32 = vpack.c.bf16 %v1114_v29, %v1113_v28 }
 0x1fd   :  { %v933_v33 = vadd.f32 %v3144_v9, %v3875_v12  ;;  %v924_v34 = vpop.f32.mrb[33].mxu1  ;;  %v1145_v10 = vpack.c.bf16 %v1112_v31, %v1111_v30 }
 0x1fe   :  { %v925_v35 = vadd.f32 %v3875_v12, %v924_v34  ;;  %v3145_v36 = vpop.f32.mrb[34].mxu1 }
 0x1ff   :  { %v1069_v37 = vmul.f32 0.01, %v933_v33  ;;  %v936_v38 = vadd.f32 %v3145_v36, %v3875_v12  ;;  %v927_v39 = vpop.f32.mrb[35].mxu1  ;;  %3202 = vmatprep.mubr.bf16.mxu0 %v1145_v10  ;;  %vm1021_vm1 = vcmp.gt.f32.partialorder %v933_v33, 0.0 }
 0x200   :  { %v1067_v40 = vmul.f32 0.01, %v925_v35  ;;  %v928_v41 = vadd.f32 %v3875_v12, %v927_v39  ;;  %3203 = vmatmul.mubr.bf16.gmra.mrb[76].mxu0 %v1146_v32  ;;  %vm1019_vm2 = vcmp.gt.f32.partialorder %v925_v35, 0.0 }
 0x201   :  { %vm1022_vm3 = vcmp.gt.f32.partialorder %v936_v38, 0.0  ;;  %v1070_v43 = vmul.f32 0.01, %v936_v38  ;;  %v1117_v45 = vsel %vm1021_vm1, %v933_v33, %v1069_v37 }
 0x202   :  { %vm1020_vm4 = vcmp.gt.f32.partialorder %v928_v41, 0.0  ;;  %v1068_v44 = vmul.f32 0.01, %v928_v41  ;;  %v1115_v48 = vsel %vm1019_vm2, %v925_v35, %v1067_v40 }
 0x203   :  { %v1118_v46 = vsel %vm1022_vm3, %v936_v38, %v1070_v43 }
 0x204   :  { %v3148_v47 = vpop.f32.mrb[36].mxu1  ;;  %v1116_v49 = vsel %vm1020_vm4, %v928_v41, %v1068_v44  ;;  %v1148_v11 = vpack.c.bf16 %v1118_v46, %v1117_v45  ;;  %v3354_v41 = vld [vmem:[%s4526_s7 + $0x38] sm:$0xff]  }
 0x205   :  { %v949_v50 = vadd.f32 %v3148_v47, %v3875_v12  ;;  %v940_v51 = vpop.f32.mrb[37].mxu1  ;;  %v1147_v52 = vpack.c.bf16 %v1116_v49, %v1115_v48  ;;  %3293 = vmatprep.subr.bf16.mxu1 %v3354_v41  ;;  %3236 = vmatprep.subr.bf16.mxu0 %v3354_v41 }
 0x206   :  { %v941_v53 = vadd.f32 %v3875_v12, %v940_v51  ;;  %v3149_v54 = vpop.f32.mrb[38].mxu1  ;;  %3301 = vmatpush3.bf16.msra.mxu1 %v3354_v41  ;;  %3237 = vmatpush3.bf16.msra.mxu0 %v3354_v41 }
 0x207   :  { %v1073_v55 = vmul.f32 0.01, %v949_v50  ;;  %v952_v56 = vadd.f32 %v3149_v54, %v3875_v12  ;;  %v943_v57 = vpop.f32.mrb[39].mxu1  ;;  %3206 = vmatprep.mubr.bf16.mxu0 %v1147_v52  ;;  %vm1025_vm5 = vcmp.gt.f32.partialorder %v949_v50, 0.0 }
 0x208   :  { %v1071_v58 = vmul.f32 0.01, %v941_v53  ;;  %v944_v59 = vadd.f32 %v3875_v12, %v943_v57  ;;  %3207 = vmatmul.mubr.bf16.gmra.mrb[80].mxu0 %v1148_v11  ;;  %vm1023_vm6 = vcmp.gt.f32.partialorder %v941_v53, 0.0 }
 0x209   :  { %vm1026_vm7 = vcmp.gt.f32.partialorder %v952_v56, 0.0  ;;  %v1074_v60 = vmul.f32 0.01, %v952_v56  ;;  %v1121_v62 = vsel %vm1025_vm5, %v949_v50, %v1073_v55 }
 0x20a   :  { %vm1024_vm8 = vcmp.gt.f32.partialorder %v944_v59, 0.0  ;;  %v1072_v61 = vmul.f32 0.01, %v944_v59  ;;  %v1119_v1 = vsel %vm1023_vm6, %v941_v53, %v1071_v58 }
 0x20b   :  { %v1122_v63 = vsel %vm1026_vm7, %v952_v56, %v1074_v60 }
 0x20c   :  { %v3152_v0 = vpop.f32.mrb[40].mxu1  ;;  %v1120_v2 = vsel %vm1024_vm8, %v944_v59, %v1072_v61  ;;  %v1150_v3 = vpack.c.bf16 %v1122_v63, %v1121_v62 }
 0x20d   :  { %v965_v4 = vadd.f32 %v3152_v0, %v3875_v12  ;;  %v956_v5 = vpop.f32.mrb[41].mxu1  ;;  %v1149_v6 = vpack.c.bf16 %v1120_v2, %v1119_v1 }
 0x20e   :  { %v957_v42 = vadd.f32 %v3875_v12, %v956_v5  ;;  %v3153_v13 = vpop.f32.mrb[42].mxu1 }
 0x20f   :  { %v1077_v7 = vmul.f32 0.01, %v965_v4  ;;  %v968_v14 = vadd.f32 %v3153_v13, %v3875_v12  ;;  %v959_v15 = vpop.f32.mrb[43].mxu1  ;;  %3210 = vmatprep.mubr.bf16.mxu0 %v1149_v6  ;;  %vm1029_vm9 = vcmp.gt.f32.partialorder %v965_v4, 0.0 }
 0x210   :  { %v1075_v16 = vmul.f32 0.01, %v957_v42  ;;  %v960_v17 = vadd.f32 %v3875_v12, %v959_v15  ;;  %3211 = vmatmul.mubr.bf16.gmra.mrb[84].mxu0 %v1150_v3  ;;  %vm1027_vm10 = vcmp.gt.f32.partialorder %v957_v42, 0.0 }
 0x211   :  { %vm1030_vm11 = vcmp.gt.f32.partialorder %v968_v14, 0.0  ;;  %v1078_v18 = vmul.f32 0.01, %v968_v14  ;;  %v1125_v19 = vsel %vm1029_vm9, %v965_v4, %v1077_v7 }
 0x212   :  { %vm1028_vm12 = vcmp.gt.f32.partialorder %v960_v17, 0.0  ;;  %v1076_v8 = vmul.f32 0.01, %v960_v17  ;;  %v1123_v22 = vsel %vm1027_vm10, %v957_v42, %v1075_v16 }
 0x213   :  { %v1126_v20 = vsel %vm1030_vm11, %v968_v14, %v1078_v18 }
 0x214   :  { %v3156_v21 = vpop.f32.mrb[44].mxu1  ;;  %v1124_v23 = vsel %vm1028_vm12, %v960_v17, %v1076_v8  ;;  %v1152_v24 = vpack.c.bf16 %v1126_v20, %v1125_v19 }
 0x215   :  { %v981_v25 = vadd.f32 %v3156_v21, %v3875_v12  ;;  %v972_v26 = vpop.f32.mrb[45].mxu1  ;;  %v1151_v27 = vpack.c.bf16 %v1124_v23, %v1123_v22 }
 0x216   :  { %v973_v28 = vadd.f32 %v3875_v12, %v972_v26  ;;  %v3157_v29 = vpop.f32.mrb[46].mxu1 }
 0x217   :  { %v1081_v9 = vmul.f32 0.01, %v981_v25  ;;  %v984_v30 = vadd.f32 %v3157_v29, %v3875_v12  ;;  %v975_v31 = vpop.f32.mrb[47].mxu1  ;;  %3214 = vmatprep.mubr.bf16.mxu0 %v1151_v27  ;;  %vm1033_vm13 = vcmp.gt.f32.partialorder %v981_v25, 0.0 }
 0x218   :  { %v1079_v32 = vmul.f32 0.01, %v973_v28  ;;  %v976_v33 = vadd.f32 %v3875_v12, %v975_v31  ;;  %3215 = vmatmul.mubr.bf16.gmra.mrb[88].mxu0 %v1152_v24  ;;  %vm1031_vm14 = vcmp.gt.f32.partialorder %v973_v28, 0.0  ;;  %v3944_v12 = vld [vmem:[%s4525_s6] ss:$0 sm:$0xff] }
 0x219   :  { %vm1034_vm15 = vcmp.gt.f32.partialorder %v984_v30, 0.0  ;;  %v1082_v34 = vmul.f32 0.01, %v984_v30  ;;  %v1129_v35 = vsel %vm1033_vm13, %v981_v25, %v1081_v9 }
 0x21a   :  { %vm1032_vm0 = vcmp.gt.f32.partialorder %v976_v33, 0.0  ;;  %v1080_v10 = vmul.f32 0.01, %v976_v33  ;;  %v1127_v37 = vsel %vm1031_vm14, %v973_v28, %v1079_v32 }
 0x21b   :  { %v1130_v36 = vsel %vm1034_vm15, %v984_v30, %v1082_v34 }
 0x21c   :  { %v1128_v38 = vsel %vm1032_vm0, %v976_v33, %v1080_v10  ;;  %v1154_v39 = vpack.c.bf16 %v1130_v36, %v1129_v35 }
 0x21d   :  { %v1153_v40 = vpack.c.bf16 %v1128_v38, %v1127_v37 }
 0x21f   :  { %3218 = vmatprep.mubr.bf16.mxu0 %v1153_v40 }
 0x220   :  { %3219 = vmatmul.mubr.bf16.gmra.mrb[92].mxu0 %v1154_v39 }
 0x29b   :  { %v3176_v43 = vpop.f32.mrb[48].mxu0 }
 0x29c   :  { %v1269_v44 = vadd.f32 %v3176_v43, %v3944_v12  ;;  %v1260_v45 = vpop.f32.mrb[49].mxu0 }
 0x29d   :  { %v1261_v46 = vadd.f32 %v3944_v12, %v1260_v45  ;;  %v3177_v47 = vpop.f32.mrb[50].mxu0 }
 0x29e   :  { %v1501_v48 = vmul.f32 0.01, %v1269_v44  ;;  %v1272_v49 = vadd.f32 %v3177_v47, %v3944_v12  ;;  %v1263_v11 = vpop.f32.mrb[51].mxu0  ;;  %vm1453_vm1 = vcmp.gt.f32.partialorder %v1269_v44, 0.0 }
 0x29f   :  { %v1499_v50 = vmul.f32 0.01, %v1261_v46  ;;  %v1264_v51 = vadd.f32 %v3944_v12, %v1263_v11  ;;  %vm1451_vm2 = vcmp.gt.f32.partialorder %v1261_v46, 0.0 }
 0x2a0   :  { %vm1454_vm3 = vcmp.gt.f32.partialorder %v1272_v49, 0.0  ;;  %v1502_v52 = vmul.f32 0.01, %v1272_v49  ;;  %v1549_v54 = vsel %vm1453_vm1, %v1269_v44, %v1501_v48 }
 0x2a1   :  { %vm1452_vm4 = vcmp.gt.f32.partialorder %v1264_v51, 0.0  ;;  %v1500_v53 = vmul.f32 0.01, %v1264_v51  ;;  %v1547_v58 = vsel %vm1451_vm2, %v1261_v46, %v1499_v50 }
 0x2a2   :  { %v1550_v55 = vsel %vm1454_vm3, %v1272_v49, %v1502_v52 }
 0x2a3   :  { %v1596_v56 = vpack.c.bf16 %v1550_v55, %v1549_v54  ;;  %v3180_v57 = vpop.f32.mrb[52].mxu0  ;;  %v1548_v59 = vsel %vm1452_vm4, %v1264_v51, %v1500_v53 }
 0x2a4   :  { %v1285_v60 = vadd.f32 %v3180_v57, %v3944_v12  ;;  %v1276_v61 = vpop.f32.mrb[53].mxu0  ;;  %v1595_v62 = vpack.c.bf16 %v1548_v59, %v1547_v58 }
 0x2a5   :  { %v1277_v63 = vadd.f32 %v3944_v12, %v1276_v61  ;;  %v3181_v0 = vpop.f32.mrb[54].mxu0 }
 0x2a6   :  { %v1505_v1 = vmul.f32 0.01, %v1285_v60  ;;  %v1288_v2 = vadd.f32 %v3181_v0, %v3944_v12  ;;  %v1279_v3 = vpop.f32.mrb[55].mxu0  ;;  %3238 = vmatprep.mubr.bf16.mxu0 %v1595_v62  ;;  %vm1457_vm5 = vcmp.gt.f32.partialorder %v1285_v60, 0.0 }
 0x2a7   :  { %v1503_v4 = vmul.f32 0.01, %v1277_v63  ;;  %v1280_v5 = vadd.f32 %v3944_v12, %v1279_v3  ;;  %3239 = vmatmul.mubr.bf16.vlgmr.msra.gmra.mrb[96].mxu0 %v1596_v56  ;;  %vm1455_vm6 = vcmp.gt.f32.partialorder %v1277_v63, 0.0 }
 0x2a8   :  { %vm1458_vm7 = vcmp.gt.f32.partialorder %v1288_v2, 0.0  ;;  %v1506_v6 = vmul.f32 0.01, %v1288_v2  ;;  %v1553_v13 = vsel %vm1457_vm5, %v1285_v60, %v1505_v1 }
 0x2a9   :  { %vm1456_vm8 = vcmp.gt.f32.partialorder %v1280_v5, 0.0  ;;  %v1504_v42 = vmul.f32 0.01, %v1280_v5  ;;  %v1551_v16 = vsel %vm1455_vm6, %v1277_v63, %v1503_v4 }
 0x2aa   :  { %v1554_v7 = vsel %vm1458_vm7, %v1288_v2, %v1506_v6 }
 0x2ab   :  { %v1598_v14 = vpack.c.bf16 %v1554_v7, %v1553_v13  ;;  %v3184_v15 = vpop.f32.mrb[56].mxu0  ;;  %v1552_v17 = vsel %vm1456_vm8, %v1280_v5, %v1504_v42 }
 0x2ac   :  { %v1301_v18 = vadd.f32 %v3184_v15, %v3944_v12  ;;  %v1292_v8 = vpop.f32.mrb[57].mxu0  ;;  %v1597_v19 = vpack.c.bf16 %v1552_v17, %v1551_v16 }
 0x2ad   :  { %v1293_v20 = vadd.f32 %v3944_v12, %v1292_v8  ;;  %v3185_v21 = vpop.f32.mrb[58].mxu0 }
 0x2ae   :  { %v1509_v22 = vmul.f32 0.01, %v1301_v18  ;;  %v1304_v23 = vadd.f32 %v3185_v21, %v3944_v12  ;;  %v1295_v24 = vpop.f32.mrb[59].mxu0  ;;  %3242 = vmatprep.mubr.bf16.mxu1 %v1597_v19  ;;  %vm1461_vm9 = vcmp.gt.f32.partialorder %v1301_v18, 0.0 }
 0x2af   :  { %v1507_v25 = vmul.f32 0.01, %v1293_v20  ;;  %v1296_v26 = vadd.f32 %v3944_v12, %v1295_v24  ;;  %3243 = vmatmul.mubr.bf16.vlgmr.msra.gmra.mrb[48].mxu1 %v1598_v14  ;;  %vm1459_vm10 = vcmp.gt.f32.partialorder %v1293_v20, 0.0 }
 0x2b0   :  { %vm1462_vm11 = vcmp.gt.f32.partialorder %v1304_v23, 0.0  ;;  %v1510_v27 = vmul.f32 0.01, %v1304_v23  ;;  %v1557_v29 = vsel %vm1461_vm9, %v1301_v18, %v1509_v22 }
 0x2b1   :  { %vm1460_vm12 = vcmp.gt.f32.partialorder %v1296_v26, 0.0  ;;  %v1508_v28 = vmul.f32 0.01, %v1296_v26  ;;  %v1555_v31 = vsel %vm1459_vm10, %v1293_v20, %v1507_v25 }
 0x2b2   :  { %v1558_v9 = vsel %vm1462_vm11, %v1304_v23, %v1510_v27 }
 0x2b3   :  { %v3188_v30 = vpop.f32.mrb[60].mxu0  ;;  %v1556_v32 = vsel %vm1460_vm12, %v1296_v26, %v1508_v28  ;;  %v1600_v33 = vpack.c.bf16 %v1558_v9, %v1557_v29 }
 0x2b4   :  { %v1317_v34 = vadd.f32 %v3188_v30, %v3944_v12  ;;  %v1308_v10 = vpop.f32.mrb[61].mxu0  ;;  %v1599_v35 = vpack.c.bf16 %v1556_v32, %v1555_v31 }
 0x2b5   :  { %v1309_v36 = vadd.f32 %v3944_v12, %v1308_v10  ;;  %v3189_v37 = vpop.f32.mrb[62].mxu0 }
 0x2b6   :  { %v1513_v38 = vmul.f32 0.01, %v1317_v34  ;;  %v1320_v39 = vadd.f32 %v3189_v37, %v3944_v12  ;;  %v1311_v40 = vpop.f32.mrb[63].mxu0  ;;  %3246 = vmatprep.mubr.bf16.mxu1 %v1599_v35  ;;  %vm1465_vm13 = vcmp.gt.f32.partialorder %v1317_v34, 0.0 }
 0x2b7   :  { %v1511_v41 = vmul.f32 0.01, %v1309_v36  ;;  %v1312_v43 = vadd.f32 %v3944_v12, %v1311_v40  ;;  %3247 = vmatmul.mubr.bf16.gmra.mrb[52].mxu1 %v1600_v33  ;;  %vm1463_vm14 = vcmp.gt.f32.partialorder %v1309_v36, 0.0 }
 0x2b8   :  { %vm1466_vm15 = vcmp.gt.f32.partialorder %v1320_v39, 0.0  ;;  %v1514_v44 = vmul.f32 0.01, %v1320_v39  ;;  %v1561_v46 = vsel %vm1465_vm13, %v1317_v34, %v1513_v38 }
 0x2b9   :  { %vm1464_vm0 = vcmp.gt.f32.partialorder %v1312_v43, 0.0  ;;  %v1512_v45 = vmul.f32 0.01, %v1312_v43  ;;  %v1559_v49 = vsel %vm1463_vm14, %v1309_v36, %v1511_v41 }
 0x2ba   :  { %v1562_v47 = vsel %vm1466_vm15, %v1320_v39, %v1514_v44 }
 0x2bb   :  { %v3192_v48 = vpop.f32.mrb[64].mxu0  ;;  %v1560_v11 = vsel %vm1464_vm0, %v1312_v43, %v1512_v45  ;;  %v1602_v50 = vpack.c.bf16 %v1562_v47, %v1561_v46 }
 0x2bc   :  { %v1333_v51 = vadd.f32 %v3192_v48, %v3944_v12  ;;  %v1324_v52 = vpop.f32.mrb[65].mxu0  ;;  %v1601_v53 = vpack.c.bf16 %v1560_v11, %v1559_v49 }
 0x2bd   :  { %v1325_v54 = vadd.f32 %v3944_v12, %v1324_v52  ;;  %v3193_v55 = vpop.f32.mrb[66].mxu0 }
 0x2be   :  { %v1517_v56 = vmul.f32 0.01, %v1333_v51  ;;  %v1336_v57 = vadd.f32 %v3193_v55, %v3944_v12  ;;  %v1327_v58 = vpop.f32.mrb[67].mxu0  ;;  %3250 = vmatprep.mubr.bf16.mxu1 %v1601_v53  ;;  %vm1469_vm1 = vcmp.gt.f32.partialorder %v1333_v51, 0.0 }
 0x2bf   :  { %v1515_v59 = vmul.f32 0.01, %v1325_v54  ;;  %v1328_v60 = vadd.f32 %v3944_v12, %v1327_v58  ;;  %3251 = vmatmul.mubr.bf16.gmra.mrb[56].mxu1 %v1602_v50  ;;  %vm1467_vm2 = vcmp.gt.f32.partialorder %v1325_v54, 0.0 }
 0x2c0   :  { %vm1470_vm3 = vcmp.gt.f32.partialorder %v1336_v57, 0.0  ;;  %v1518_v61 = vmul.f32 0.01, %v1336_v57  ;;  %v1565_v63 = vsel %vm1469_vm1, %v1333_v51, %v1517_v56 }
 0x2c1   :  { %vm1468_vm4 = vcmp.gt.f32.partialorder %v1328_v60, 0.0  ;;  %v1516_v62 = vmul.f32 0.01, %v1328_v60  ;;  %v1563_v2 = vsel %vm1467_vm2, %v1325_v54, %v1515_v59 }
 0x2c2   :  { %v1566_v0 = vsel %vm1470_vm3, %v1336_v57, %v1518_v61 }
 0x2c3   :  { %v3196_v1 = vpop.f32.mrb[68].mxu0  ;;  %v1564_v3 = vsel %vm1468_vm4, %v1328_v60, %v1516_v62  ;;  %v1604_v4 = vpack.c.bf16 %v1566_v0, %v1565_v63 }
 0x2c4   :  { %v1349_v5 = vadd.f32 %v3196_v1, %v3944_v12  ;;  %v1340_v6 = vpop.f32.mrb[69].mxu0  ;;  %v1603_v42 = vpack.c.bf16 %v1564_v3, %v1563_v2 }
 0x2c5   :  { %v1341_v13 = vadd.f32 %v3944_v12, %v1340_v6  ;;  %v3197_v7 = vpop.f32.mrb[70].mxu0 }
 0x2c6   :  { %v1521_v14 = vmul.f32 0.01, %v1349_v5  ;;  %v1352_v15 = vadd.f32 %v3197_v7, %v3944_v12  ;;  %v1343_v16 = vpop.f32.mrb[71].mxu0  ;;  %3254 = vmatprep.mubr.bf16.mxu1 %v1603_v42  ;;  %vm1473_vm5 = vcmp.gt.f32.partialorder %v1349_v5, 0.0 }
 0x2c7   :  { %v1519_v17 = vmul.f32 0.01, %v1341_v13  ;;  %v1344_v18 = vadd.f32 %v3944_v12, %v1343_v16  ;;  %3255 = vmatmul.mubr.bf16.gmra.mrb[60].mxu1 %v1604_v4  ;;  %vm1471_vm6 = vcmp.gt.f32.partialorder %v1341_v13, 0.0 }
 0x2c8   :  { %vm1474_vm7 = vcmp.gt.f32.partialorder %v1352_v15, 0.0  ;;  %v1522_v8 = vmul.f32 0.01, %v1352_v15  ;;  %v1569_v20 = vsel %vm1473_vm5, %v1349_v5, %v1521_v14 }
 0x2c9   :  { %vm1472_vm8 = vcmp.gt.f32.partialorder %v1344_v18, 0.0  ;;  %v1520_v19 = vmul.f32 0.01, %v1344_v18  ;;  %v1567_v23 = vsel %vm1471_vm6, %v1341_v13, %v1519_v17 }
 0x2ca   :  { %v1570_v21 = vsel %vm1474_vm7, %v1352_v15, %v1522_v8 }
 0x2cb   :  { %v3200_v22 = vpop.f32.mrb[72].mxu0  ;;  %v1568_v24 = vsel %vm1472_vm8, %v1344_v18, %v1520_v19  ;;  %v1606_v25 = vpack.c.bf16 %v1570_v21, %v1569_v20 }
 0x2cc   :  { %v1365_v26 = vadd.f32 %v3200_v22, %v3944_v12  ;;  %v1356_v27 = vpop.f32.mrb[73].mxu0  ;;  %v1605_v28 = vpack.c.bf16 %v1568_v24, %v1567_v23 }
 0x2cd   :  { %v1357_v29 = vadd.f32 %v3944_v12, %v1356_v27  ;;  %v3201_v9 = vpop.f32.mrb[74].mxu0 }
 0x2ce   :  { %v1525_v30 = vmul.f32 0.01, %v1365_v26  ;;  %v1368_v31 = vadd.f32 %v3201_v9, %v3944_v12  ;;  %v1359_v32 = vpop.f32.mrb[75].mxu0  ;;  %3258 = vmatprep.mubr.bf16.mxu1 %v1605_v28  ;;  %vm1477_vm9 = vcmp.gt.f32.partialorder %v1365_v26, 0.0 }
 0x2cf   :  { %v1523_v33 = vmul.f32 0.01, %v1357_v29  ;;  %v1360_v34 = vadd.f32 %v3944_v12, %v1359_v32  ;;  %3259 = vmatmul.mubr.bf16.gmra.mrb[64].mxu1 %v1606_v25  ;;  %vm1475_vm10 = vcmp.gt.f32.partialorder %v1357_v29, 0.0 }
 0x2d0   :  { %vm1478_vm11 = vcmp.gt.f32.partialorder %v1368_v31, 0.0  ;;  %v1526_v10 = vmul.f32 0.01, %v1368_v31  ;;  %v1573_v36 = vsel %vm1477_vm9, %v1365_v26, %v1525_v30 }
 0x2d1   :  { %vm1476_vm12 = vcmp.gt.f32.partialorder %v1360_v34, 0.0  ;;  %v1524_v35 = vmul.f32 0.01, %v1360_v34  ;;  %v1571_v39 = vsel %vm1475_vm10, %v1357_v29, %v1523_v33 }
 0x2d2   :  { %v1574_v37 = vsel %vm1478_vm11, %v1368_v31, %v1526_v10 }
 0x2d3   :  { %v3204_v38 = vpop.f32.mrb[76].mxu0  ;;  %v1572_v40 = vsel %vm1476_vm12, %v1360_v34, %v1524_v35  ;;  %v1608_v41 = vpack.c.bf16 %v1574_v37, %v1573_v36 }
 0x2d4   :  { %v1381_v43 = vadd.f32 %v3204_v38, %v3944_v12  ;;  %v1372_v44 = vpop.f32.mrb[77].mxu0  ;;  %v1607_v45 = vpack.c.bf16 %v1572_v40, %v1571_v39 }
 0x2d5   :  { %v1373_v46 = vadd.f32 %v3944_v12, %v1372_v44  ;;  %v3205_v47 = vpop.f32.mrb[78].mxu0 }
 0x2d6   :  { %v1529_v48 = vmul.f32 0.01, %v1381_v43  ;;  %v1384_v49 = vadd.f32 %v3205_v47, %v3944_v12  ;;  %v1375_v11 = vpop.f32.mrb[79].mxu0  ;;  %3262 = vmatprep.mubr.bf16.mxu1 %v1607_v45  ;;  %vm1481_vm13 = vcmp.gt.f32.partialorder %v1381_v43, 0.0 }
 0x2d7   :  { %v1527_v50 = vmul.f32 0.01, %v1373_v46  ;;  %v1376_v51 = vadd.f32 %v3944_v12, %v1375_v11  ;;  %3263 = vmatmul.mubr.bf16.gmra.mrb[68].mxu1 %v1608_v41  ;;  %vm1479_vm14 = vcmp.gt.f32.partialorder %v1373_v46, 0.0 }
 0x2d8   :  { %vm1482_vm15 = vcmp.gt.f32.partialorder %v1384_v49, 0.0  ;;  %v1530_v52 = vmul.f32 0.01, %v1384_v49  ;;  %v1577_v54 = vsel %vm1481_vm13, %v1381_v43, %v1529_v48 }
 0x2d9   :  { %vm1480_vm0 = vcmp.gt.f32.partialorder %v1376_v51, 0.0  ;;  %v1528_v53 = vmul.f32 0.01, %v1376_v51  ;;  %v1575_v57 = vsel %vm1479_vm14, %v1373_v46, %v1527_v50 }
 0x2da   :  { %v1578_v55 = vsel %vm1482_vm15, %v1384_v49, %v1530_v52 }
 0x2db   :  { %v3208_v56 = vpop.f32.mrb[80].mxu0  ;;  %v1576_v58 = vsel %vm1480_vm0, %v1376_v51, %v1528_v53  ;;  %v1610_v59 = vpack.c.bf16 %v1578_v55, %v1577_v54 }
 0x2dc   :  { %v1397_v60 = vadd.f32 %v3208_v56, %v3944_v12  ;;  %v1388_v61 = vpop.f32.mrb[81].mxu0  ;;  %v1609_v62 = vpack.c.bf16 %v1576_v58, %v1575_v57 }
 0x2dd   :  { %v1389_v63 = vadd.f32 %v3944_v12, %v1388_v61  ;;  %v3209_v0 = vpop.f32.mrb[82].mxu0 }
 0x2de   :  { %v1533_v1 = vmul.f32 0.01, %v1397_v60  ;;  %v1400_v2 = vadd.f32 %v3209_v0, %v3944_v12  ;;  %v1391_v3 = vpop.f32.mrb[83].mxu0  ;;  %3266 = vmatprep.mubr.bf16.mxu1 %v1609_v62  ;;  %vm1485_vm1 = vcmp.gt.f32.partialorder %v1397_v60, 0.0 }
 0x2df   :  { %v1531_v4 = vmul.f32 0.01, %v1389_v63  ;;  %v1392_v5 = vadd.f32 %v3944_v12, %v1391_v3  ;;  %3267 = vmatmul.mubr.bf16.gmra.mrb[72].mxu1 %v1610_v59  ;;  %vm1483_vm2 = vcmp.gt.f32.partialorder %v1389_v63, 0.0 }
 0x2e0   :  { %vm1486_vm3 = vcmp.gt.f32.partialorder %v1400_v2, 0.0  ;;  %v1534_v6 = vmul.f32 0.01, %v1400_v2  ;;  %v1581_v13 = vsel %vm1485_vm1, %v1397_v60, %v1533_v1 }
 0x2e1   :  { %vm1484_vm4 = vcmp.gt.f32.partialorder %v1392_v5, 0.0  ;;  %v1532_v42 = vmul.f32 0.01, %v1392_v5  ;;  %v1579_v15 = vsel %vm1483_vm2, %v1389_v63, %v1531_v4 }
 0x2e2   :  { %v1582_v7 = vsel %vm1486_vm3, %v1400_v2, %v1534_v6 }
 0x2e3   :  { %v3212_v14 = vpop.f32.mrb[84].mxu0  ;;  %v1580_v16 = vsel %vm1484_vm4, %v1392_v5, %v1532_v42  ;;  %v1612_v17 = vpack.c.bf16 %v1582_v7, %v1581_v13  ;;  %v3997_v5 = vld [vmem:[%s4527_s8] ss:$0 sm:$0xff] }
 0x2e4   :  { %v1413_v18 = vadd.f32 %v3212_v14, %v3944_v12  ;;  %v1404_v8 = vpop.f32.mrb[85].mxu0  ;;  %v1611_v19 = vpack.c.bf16 %v1580_v16, %v1579_v15 }
 0x2e5   :  { %v1405_v20 = vadd.f32 %v3944_v12, %v1404_v8  ;;  %v3213_v21 = vpop.f32.mrb[86].mxu0 }
 0x2e6   :  { %v1537_v22 = vmul.f32 0.01, %v1413_v18  ;;  %v1416_v23 = vadd.f32 %v3213_v21, %v3944_v12  ;;  %v1407_v24 = vpop.f32.mrb[87].mxu0  ;;  %3270 = vmatprep.mubr.bf16.mxu1 %v1611_v19  ;;  %vm1489_vm5 = vcmp.gt.f32.partialorder %v1413_v18, 0.0 }
 0x2e7   :  { %v1535_v25 = vmul.f32 0.01, %v1405_v20  ;;  %v1408_v26 = vadd.f32 %v3944_v12, %v1407_v24  ;;  %3271 = vmatmul.mubr.bf16.gmra.mrb[76].mxu1 %v1612_v17  ;;  %vm1487_vm6 = vcmp.gt.f32.partialorder %v1405_v20, 0.0 }
 0x2e8   :  { %vm1490_vm7 = vcmp.gt.f32.partialorder %v1416_v23, 0.0  ;;  %v1538_v27 = vmul.f32 0.01, %v1416_v23  ;;  %v1585_v29 = vsel %vm1489_vm5, %v1413_v18, %v1537_v22 }
 0x2e9   :  { %vm1488_vm8 = vcmp.gt.f32.partialorder %v1408_v26, 0.0  ;;  %v1536_v28 = vmul.f32 0.01, %v1408_v26  ;;  %v1583_v31 = vsel %vm1487_vm6, %v1405_v20, %v1535_v25 }
 0x2ea   :  { %v1586_v9 = vsel %vm1490_vm7, %v1416_v23, %v1538_v27 }
 0x2eb   :  { %v3216_v30 = vpop.f32.mrb[88].mxu0  ;;  %v1584_v32 = vsel %vm1488_vm8, %v1408_v26, %v1536_v28  ;;  %v1614_v33 = vpack.c.bf16 %v1586_v9, %v1585_v29 }
 0x2ec   :  { %v1429_v34 = vadd.f32 %v3216_v30, %v3944_v12  ;;  %v1420_v10 = vpop.f32.mrb[89].mxu0  ;;  %v1613_v35 = vpack.c.bf16 %v1584_v32, %v1583_v31 }
 0x2ed   :  { %v1421_v36 = vadd.f32 %v3944_v12, %v1420_v10  ;;  %v3217_v37 = vpop.f32.mrb[90].mxu0 }
 0x2ee   :  { %v1541_v38 = vmul.f32 0.01, %v1429_v34  ;;  %v1432_v39 = vadd.f32 %v3217_v37, %v3944_v12  ;;  %v1423_v40 = vpop.f32.mrb[91].mxu0  ;;  %3274 = vmatprep.mubr.bf16.mxu1 %v1613_v35  ;;  %vm1493_vm9 = vcmp.gt.f32.partialorder %v1429_v34, 0.0 }
 0x2ef   :  { %v1539_v41 = vmul.f32 0.01, %v1421_v36  ;;  %v1424_v43 = vadd.f32 %v3944_v12, %v1423_v40  ;;  %3275 = vmatmul.mubr.bf16.gmra.mrb[80].mxu1 %v1614_v33  ;;  %vm1491_vm10 = vcmp.gt.f32.partialorder %v1421_v36, 0.0 }
 0x2f0   :  { %vm1494_vm11 = vcmp.gt.f32.partialorder %v1432_v39, 0.0  ;;  %v1542_v44 = vmul.f32 0.01, %v1432_v39  ;;  %v1589_v46 = vsel %vm1493_vm9, %v1429_v34, %v1541_v38 }
 0x2f1   :  { %vm1492_vm12 = vcmp.gt.f32.partialorder %v1424_v43, 0.0  ;;  %v1540_v45 = vmul.f32 0.01, %v1424_v43  ;;  %v1587_v49 = vsel %vm1491_vm10, %v1421_v36, %v1539_v41 }
 0x2f2   :  { %v1590_v47 = vsel %vm1494_vm11, %v1432_v39, %v1542_v44 }
 0x2f3   :  { %v3220_v48 = vpop.f32.mrb[92].mxu0  ;;  %v1588_v11 = vsel %vm1492_vm12, %v1424_v43, %v1540_v45  ;;  %v1616_v50 = vpack.c.bf16 %v1590_v47, %v1589_v46 }
 0x2f4   :  { %v1445_v51 = vadd.f32 %v3220_v48, %v3944_v12  ;;  %v1436_v52 = vpop.f32.mrb[93].mxu0  ;;  %v1615_v53 = vpack.c.bf16 %v1588_v11, %v1587_v49 }
 0x2f5   :  { %v1437_v54 = vadd.f32 %v3944_v12, %v1436_v52  ;;  %v3221_v55 = vpop.f32.mrb[94].mxu0 }
 0x2f6   :  { %v1545_v56 = vmul.f32 0.01, %v1445_v51  ;;  %v1448_v57 = vadd.f32 %v3221_v55, %v3944_v12  ;;  %v1439_v58 = vpop.f32.mrb[95].mxu0  ;;  %3278 = vmatprep.mubr.bf16.mxu1 %v1615_v53  ;;  %vm1497_vm13 = vcmp.gt.f32.partialorder %v1445_v51, 0.0 }
 0x2f7   :  { %v1543_v59 = vmul.f32 0.01, %v1437_v54  ;;  %v1440_v60 = vadd.f32 %v3944_v12, %v1439_v58  ;;  %3279 = vmatmul.mubr.bf16.gmra.mrb[84].mxu1 %v1616_v50  ;;  %vm1495_vm14 = vcmp.gt.f32.partialorder %v1437_v54, 0.0 }
 0x2f8   :  { %vm1498_vm15 = vcmp.gt.f32.partialorder %v1448_v57, 0.0  ;;  %v1546_v61 = vmul.f32 0.01, %v1448_v57  ;;  %v1593_v63 = vsel %vm1497_vm13, %v1445_v51, %v1545_v56 }
 0x2f9   :  { %vm1496_vm0 = vcmp.gt.f32.partialorder %v1440_v60, 0.0  ;;  %v1544_v62 = vmul.f32 0.01, %v1440_v60  ;;  %v1591_v1 = vsel %vm1495_vm14, %v1437_v54, %v1543_v59 }
 0x2fa   :  { %v1594_v0 = vsel %vm1498_vm15, %v1448_v57, %v1546_v61 }
 0x2fb   :  { %v1592_v2 = vsel %vm1496_vm0, %v1440_v60, %v1544_v62  ;;  %v1618_v3 = vpack.c.bf16 %v1594_v0, %v1593_v63 }
 0x2fc   :  { %v1617_v4 = vpack.c.bf16 %v1592_v2, %v1591_v1 }
 0x2fe   :  { %3282 = vmatprep.mubr.bf16.mxu1 %v1617_v4 }
 0x2ff   :  { %3283 = vmatmul.mubr.bf16.gmra.mrb[88].mxu1 %v1618_v3 }
 0x37a   :  { %v3240_v12 = vpop.f32.mrb[96].mxu0 }
 0x37b   :  { %v4000_v6 = vadd.f32 %v3240_v12, %v3997_v5  ;;  %v1724_v42 = vpop.f32.mrb[97].mxu0 }
 0x37c   :  { %v4003_v13 = vadd.f32 %v3997_v5, %v1724_v42  ;;  %v3241_v7 = vpop.f32.mrb[98].mxu0 }
 0x37d   :  { %v1917_v14 = vand.u32 2147483647, %v4000_v6  ;;  %v4007_v15 = vadd.f32 %v3241_v7, %v3997_v5  ;;  %v1727_v16 = vpop.f32.mrb[99].mxu0  ;;  %vm2205_vm1 = vcmp.ge.f32.partialorder %v4000_v6, 0.0 }
 0x37e   :  { %v1915_v17 = vand.u32 2147483647, %v4003_v13  ;;  %v4011_v18 = vadd.f32 %v3997_v5, %v1727_v16  ;;  %vm2203_vm2 = vcmp.ge.f32.partialorder %v4003_v13, 0.0 }
 0x37f   :  { %v1965_v8 = vsub.f32 0.0, %v1917_v14  ;;  %v1918_v19 = vand.u32 2147483647, %v4007_v15  ;;  %vm2206_vm3 = vcmp.ge.f32.partialorder %v4007_v15, 0.0 }
 0x380   :  { %v1963_v20 = vsub.f32 0.0, %v1915_v17  ;;  %v1916_v21 = vand.u32 2147483647, %v4011_v18  ;;  %vm2204_vm4 = vcmp.ge.f32.partialorder %v4011_v18, 0.0 }
 0x381   :  { %v2015_v22 = vmul.f32 1.442695, %v1965_v8  ;;  %v1966_v23 = vsub.f32 0.0, %v1918_v19 }
 0x382   :  { %v2011_v24 = vmul.f32 1.442695, %v1963_v20  ;;  %v1964_v25 = vsub.f32 0.0, %v1916_v21  ;;  %v3244_v26 = vpop.f32.mrb[48].mxu1 }
 0x383   :  { %3355 = vpow2.f32 %v2015_v22  ;;  %v2017_v27 = vmul.f32 1.442695, %v1966_v23  ;;  %v4016_v28 = vadd.f32 %v3244_v26, %v3997_v5  ;;  %v1740_v29 = vpop.f32.mrb[49].mxu1 }
 0x384   :  { %3357 = vpow2.f32 %v2011_v24  ;;  %v2013_v9 = vmul.f32 1.442695, %v1964_v25  ;;  %v4019_v30 = vadd.f32 %v3997_v5, %v1740_v29  ;;  %v3245_v31 = vpop.f32.mrb[50].mxu1 }
 0x385   :  { %3359 = vpow2.f32 %v2017_v27  ;;  %v1921_v32 = vand.u32 2147483647, %v4016_v28  ;;  %v4023_v33 = vadd.f32 %v3245_v31, %v3997_v5  ;;  %v1743_v34 = vpop.f32.mrb[51].mxu1  ;;  %vm2209_vm5 = vcmp.ge.f32.partialorder %v4016_v28, 0.0 }
 0x386   :  { %3361 = vpow2.f32 %v2013_v9  ;;  %v1919_v10 = vand.u32 2147483647, %v4019_v30  ;;  %v4027_v35 = vadd.f32 %v3997_v5, %v1743_v34  ;;  %vm2207_vm6 = vcmp.ge.f32.partialorder %v4019_v30, 0.0 }
 0x387   :  { %v1969_v36 = vsub.f32 0.0, %v1921_v32  ;;  %v1922_v37 = vand.u32 2147483647, %v4023_v33  ;;  %vm2210_vm7 = vcmp.ge.f32.partialorder %v4023_v33, 0.0 }
 0x388   :  { %v1967_v38 = vsub.f32 0.0, %v1919_v10  ;;  %v1920_v39 = vand.u32 2147483647, %v4027_v35  ;;  %vm2208_vm8 = vcmp.ge.f32.partialorder %v4027_v35, 0.0 }
 0x389   :  { %v2023_v40 = vmul.f32 1.442695, %v1969_v36  ;;  %v1970_v41 = vsub.f32 0.0, %v1922_v37 }
 0x38a   :  { %v2019_v43 = vmul.f32 1.442695, %v1967_v38  ;;  %v1968_v44 = vsub.f32 0.0, %v1920_v39  ;;  %v3248_v45 = vpop.f32.mrb[52].mxu1 }
 0x38b   :  { %3363 = vpow2.f32 %v2023_v40  ;;  %v2025_v46 = vmul.f32 1.442695, %v1970_v41  ;;  %v4032_v47 = vadd.f32 %v3248_v45, %v3997_v5  ;;  %v1756_v48 = vpop.f32.mrb[53].mxu1 }
 0x38c   :  { %3365 = vpow2.f32 %v2019_v43  ;;  %v2021_v49 = vmul.f32 1.442695, %v1968_v44  ;;  %v4035_v11 = vadd.f32 %v3997_v5, %v1756_v48  ;;  %v3249_v50 = vpop.f32.mrb[54].mxu1 }
 0x38d   :  { %v4037_v51 = vpop.eup %3355  ;;  %3367 = vpow2.f32 %v2025_v46  ;;  %v1925_v52 = vand.u32 2147483647, %v4032_v47  ;;  %v4041_v53 = vadd.f32 %v3249_v50, %v3997_v5  ;;  %v1759_v54 = vpop.f32.mrb[55].mxu1  ;;  %vm2213_vm9 = vcmp.ge.f32.partialorder %v4032_v47, 0.0 }
 0x38e   :  { %v4043_v55 = vpop.eup %3357  ;;  %v2109_v56 = vadd.f32 1.0, %v4037_v51  ;;  %3369 = vpow2.f32 %v2021_v49  ;;  %v1923_v57 = vand.u32 2147483647, %v4035_v11  ;;  %v4055_v1 = vadd.f32 %v3997_v5, %v1759_v54 }
 0x38f   :  { %v4047_v58 = vpop.eup %3359  ;;  %v2107_v59 = vadd.f32 1.0, %v4043_v55  ;;  %v1973_v60 = vsub.f32 0.0, %v1925_v52  ;;  %v1926_v61 = vand.u32 2147483647, %v4041_v53  ;;  %vm2211_vm10 = vcmp.ge.f32.partialorder %v4035_v11, 0.0 }
 0x390   :  { %v4051_v62 = vpop.eup %3361  ;;  %3371 = vrcp.f32 %v2109_v56  ;;  %v2110_v63 = vadd.f32 1.0, %v4047_v58  ;;  %v1971_v0 = vsub.f32 0.0, %v1923_v57  ;;  %v1924_v42 = vand.u32 2147483647, %v4055_v1 }
 0x391   :  { %3373 = vrcp.f32 %v2107_v59  ;;  %v2108_v2 = vadd.f32 1.0, %v4051_v62  ;;  %v2031_v3 = vmul.f32 1.442695, %v1973_v60  ;;  %v1974_v4 = vsub.f32 0.0, %v1926_v61 }
 0x392   :  { %3375 = vrcp.f32 %v2110_v63  ;;  %v2027_v12 = vmul.f32 1.442695, %v1971_v0  ;;  %v3252_v7 = vpop.f32.mrb[56].mxu1  ;;  %v1972_v8 = vsub.f32 0.0, %v1924_v42  ;;  %vm2214_vm11 = vcmp.ge.f32.partialorder %v4041_v53, 0.0 }
 0x393   :  { %3377 = vrcp.f32 %v2108_v2  ;;  %v2033_v14 = vmul.f32 1.442695, %v1974_v4  ;;  %v4060_v16 = vadd.f32 %v3252_v7, %v3997_v5  ;;  %v1772_v17 = vpop.f32.mrb[57].mxu1  ;;  %vm2212_vm12 = vcmp.ge.f32.partialorder %v4055_v1, 0.0 }
 0x394   :  { %3379 = vpow2.f32 %v2031_v3  ;;  %v4063_v19 = vadd.f32 %v3997_v5, %v1772_v17  ;;  %v3253_v20 = vpop.f32.mrb[58].mxu1  ;;  %v2029_v36 = vmul.f32 1.442695, %v1972_v8 }
 0x395   :  { %v4065_v21 = vpop.eup %3363  ;;  %3381 = vpow2.f32 %v2027_v12  ;;  %v1929_v22 = vand.u32 2147483647, %v4060_v16  ;;  %v4069_v23 = vadd.f32 %v3253_v20, %v3997_v5  ;;  %v1775_v24 = vpop.f32.mrb[59].mxu1  ;;  %vm2217_vm13 = vcmp.ge.f32.partialorder %v4060_v16, 0.0 }
 0x396   :  { %v4071_v25 = vpop.eup %3365  ;;  %v2113_v26 = vadd.f32 1.0, %v4065_v21  ;;  %3383 = vpow2.f32 %v2033_v14  ;;  %v1927_v27 = vand.u32 2147483647, %v4063_v19  ;;  %v4087_v44 = vadd.f32 %v3997_v5, %v1775_v24 }
 0x397   :  { %v4076_v29 = vpop.eup %3367  ;;  %v2111_v9 = vadd.f32 1.0, %v4071_v25  ;;  %v1977_v31 = vsub.f32 0.0, %v1929_v22  ;;  %v1930_v32 = vand.u32 2147483647, %v4069_v23  ;;  %vm2218_vm14 = vcmp.ge.f32.partialorder %v4069_v23, 0.0 }
 0x398   :  { %v4081_v34 = vpop.eup %3369  ;;  %3385 = vrcp.f32 %v2113_v26  ;;  %v2114_v10 = vadd.f32 1.0, %v4076_v29  ;;  %v1975_v37 = vsub.f32 0.0, %v1927_v27  ;;  %v1928_v57 = vand.u32 2147483647, %v4087_v44 }
 0x399   :  { %3387 = vrcp.f32 %v2111_v9  ;;  %v2112_v38 = vadd.f32 1.0, %v4081_v34  ;;  %v2039_v39 = vmul.f32 1.442695, %v1977_v31  ;;  %v1978_v40 = vsub.f32 0.0, %v1930_v32 }
 0x39a   :  { %v3372_v41 = vpop.eup %3371  ;;  %3389 = vrcp.f32 %v2114_v10  ;;  %v2035_v43 = vmul.f32 1.442695, %v1975_v37  ;;  %v3256_v45 = vpop.f32.mrb[60].mxu1  ;;  %v1976_v4 = vsub.f32 0.0, %v1928_v57  ;;  %vm2215_vm15 = vcmp.ge.f32.partialorder %v4063_v19, 0.0 }
 0x39b   :  { %v3374_v46 = vpop.eup %3373  ;;  %v2253_v48 = vmul.f32 %v3372_v41, %v4037_v51  ;;  %3391 = vrcp.f32 %v2112_v38  ;;  %v2041_v49 = vmul.f32 1.442695, %v1978_v40  ;;  %v4091_v50 = vadd.f32 %v3256_v45, %v3997_v5  ;;  %v1788_v52 = vpop.f32.mrb[61].mxu1 }
 0x39c   :  { %v3376_v54 = vpop.eup %3375  ;;  %v2251_v56 = vmul.f32 %v3374_v46, %v4043_v55  ;;  %3393 = vpow2.f32 %v2029_v36  ;;  %v3257_v59 = vpop.f32.mrb[62].mxu1  ;;  %v4118_v24 = vadd.f32 %v3997_v5, %v1788_v52  ;;  %vm2216_vm0 = vcmp.ge.f32.partialorder %v4087_v44, 0.0 }
 0x39d   :  { %v3378_v60 = vpop.eup %3377  ;;  %v2301_v61 = vsel %vm2205_vm1, %v3372_v41, %v2253_v48  ;;  %v2254_v51 = vmul.f32 %v3376_v54, %v4047_v58  ;;  %3395 = vpow2.f32 %v2039_v39  ;;  %v1933_v63 = vand.u32 2147483647, %v4091_v50  ;;  %v1791_v0 = vpop.f32.mrb[63].mxu1 }
 0x39e   :  { %v4100_v2 = vpop.eup %3379  ;;  %v2299_v55 = vsel %vm2203_vm2, %v3374_v46, %v2251_v56  ;;  %v2252_v3 = vmul.f32 %v3378_v60, %v4051_v62  ;;  %3397 = vpow2.f32 %v2035_v43  ;;  %v2037_v62 = vmul.f32 1.442695, %v1976_v4 }
 0x39f   :  { %v4105_v12 = vpop.eup %3381  ;;  %v2302_v6 = vsel %vm2206_vm3, %v3376_v54, %v2254_v51  ;;  %v2117_v58 = vadd.f32 1.0, %v4100_v2  ;;  %3399 = vpow2.f32 %v2041_v49  ;;  %v1981_v42 = vsub.f32 0.0, %v1933_v63 }
 0x3a0   :  { %v4110_v7 = vpop.eup %3383  ;;  %v2785_v14 = vpack.c.bf16 %v2302_v6, %v2301_v61  ;;  %v2300_v13 = vsel %vm2204_vm4, %v3378_v60, %v2252_v3  ;;  %v2115_v17 = vadd.f32 1.0, %v4105_v12  ;;  %v4121_v26 = vadd.f32 %v3257_v59, %v3997_v5 }
 0x3a1   :  { %v2780_v8 = vpack.c.bf16 %v2300_v13, %v2299_v55  ;;  %3401 = vrcp.f32 %v2117_v58  ;;  %v2118_v20 = vadd.f32 1.0, %v4110_v7  ;;  %v2047_v22 = vmul.f32 1.442695, %v1981_v42 }
 0x3a2   :  { %v3386_v15 = vpop.eup %3385  ;;  %2897 = vst [vmem:[#allocation2 + $0x8] sm:$0xff] %v2785_v14   ;;  %3403 = vrcp.f32 %v2115_v17  ;;  %v3260_v18 = vpop.f32.mrb[64].mxu1  ;;  %v4126_v31 = vadd.f32 %v3997_v5, %v1791_v0  ;;  %v1931_v37 = vand.u32 2147483647, %v4118_v24  ;;  %vm2221_vm1 = vcmp.ge.f32.partialorder %v4091_v50, 0.0 }
 0x3a3   :  { %v3388_v27 = vpop.eup %3387  ;;  %2781 = vst [vmem:[#allocation2] sm:$0xff] %v2780_v8   ;;  %v2257_v9 = vmul.f32 %v3386_v15, %v4065_v21  ;;  %3405 = vrcp.f32 %v2118_v20  ;;  %v1804_v32 = vpop.f32.mrb[65].mxu1  ;;  %v1934_v21 = vand.u32 2147483647, %v4121_v26  ;;  %v4140_v48 = vadd.f32 %v3260_v18, %v3997_v5 }
 0x3a4   :  { %v3390_v10 = vpop.eup %3389  ;;  %v2255_v36 = vmul.f32 %v3388_v27, %v4071_v25  ;;  %3407 = vpow2.f32 %v2037_v62  ;;  %v3261_v38 = vpop.f32.mrb[66].mxu1  ;;  %v1979_v46 = vsub.f32 0.0, %v1931_v37  ;;  %v1932_v56 = vand.u32 2147483647, %v4126_v31 }
 0x3a5   :  { %v3392_v39 = vpop.eup %3391  ;;  %v2258_v40 = vmul.f32 %v3390_v10, %v4076_v29  ;;  %3409 = vpow2.f32 %v2047_v22  ;;  %v1807_v41 = vpop.f32.mrb[67].mxu1  ;;  %v2305_v25 = vsel %vm2209_vm5, %v3386_v15, %v2257_v9  ;;  %v1982_v54 = vsub.f32 0.0, %v1934_v21 }
 0x3a6   :  { %v4134_v43 = vpop.eup %3393  ;;  %v2256_v45 = vmul.f32 %v3392_v39, %v4081_v34  ;;  %v2303_v28 = vsel %vm2207_vm6, %v3388_v27, %v2255_v36  ;;  %v2043_v63 = vmul.f32 1.442695, %v1979_v46  ;;  %v1980_v30 = vsub.f32 0.0, %v1932_v56 }
 0x3a7   :  { %v4142_v49 = vpop.eup %3395  ;;  %v2306_v29 = vsel %vm2210_vm7, %v3390_v10, %v2258_v40  ;;  %v2116_v52 = vadd.f32 1.0, %v4134_v43  ;;  %v2049_v55 = vmul.f32 1.442695, %v1982_v54  ;;  %v1937_v35 = vand.u32 2147483647, %v4140_v48 }
 0x3a8   :  { %v4148_v57 = vpop.eup %3397  ;;  %v2795_v34 = vpack.c.bf16 %v2306_v29, %v2305_v25  ;;  %v2304_v59 = vsel %vm2208_vm8, %v3392_v39, %v2256_v45  ;;  %v2121_v60 = vadd.f32 1.0, %v4142_v49  ;;  %v4161_v6 = vadd.f32 %v3997_v5, %v1804_v32 }
 0x3a9   :  { %v4155_v61 = vpop.eup %3399  ;;  %v2790_v33 = vpack.c.bf16 %v2304_v59, %v2303_v28  ;;  %3411 = vrcp.f32 %v2116_v52  ;;  %v2119_v51 = vadd.f32 1.0, %v4148_v57  ;;  %v2045_v13 = vmul.f32 1.442695, %v1980_v30 }
 0x3aa   :  { %2899 = vst [vmem:[#allocation2 + $0x18] sm:$0xff] %v2795_v34   ;;  %3413 = vrcp.f32 %v2121_v60  ;;  %v2122_v0 = vadd.f32 1.0, %v4155_v61  ;;  %v3264_v3 = vpop.f32.mrb[68].mxu1  ;;  %v4165_v17 = vadd.f32 %v3261_v38, %v3997_v5  ;;  %v1985_v20 = vsub.f32 0.0, %v1937_v35 }
 0x3ab   :  { %v3402_v4 = vpop.eup %3401  ;;  %2898 = vst [vmem:[#allocation2 + $0x10] sm:$0xff] %v2790_v33   ;;  %3415 = vrcp.f32 %v2119_v51  ;;  %v1820_v58 = vpop.f32.mrb[69].mxu1  ;;  %v1935_v22 = vand.u32 2147483647, %v4161_v6  ;;  %v4189_v25 = vadd.f32 %v3264_v3, %v3997_v5  ;;  %vm2219_vm2 = vcmp.ge.f32.partialorder %v4118_v24, 0.0 }
 0x3ac   :  { %v3404_v42 = vpop.eup %3403  ;;  %v2261_v14 = vmul.f32 %v3402_v4, %v4100_v2  ;;  %3417 = vrcp.f32 %v2122_v0  ;;  %v4167_v62 = vpop.f32.mrb[70].mxu1  ;;  %v2055_v9 = vmul.f32 1.442695, %v1985_v20  ;;  %v1938_v37 = vand.u32 2147483647, %v4165_v17 }
 0x3ad   :  { %v3406_v8 = vpop.eup %3405  ;;  %3419 = vpow2.f32 %v2043_v63  ;;  %v4171_v15 = vpop.f32.mrb[71].mxu1  ;;  %v1983_v36 = vsub.f32 0.0, %v1935_v22  ;;  %v2259_v39 = vmul.f32 %v3404_v42, %v4105_v12  ;;  %v4194_v52 = vadd.f32 %v3997_v5, %v1820_v58 }
 0x3ae   :  { %v4173_v18 = vpop.eup %3407  ;;  %v2262_v2 = vmul.f32 %v3406_v8, %v4110_v7  ;;  %3421 = vpow2.f32 %v2049_v55  ;;  %v2309_v32 = vsel %vm2213_vm9, %v3402_v4, %v2261_v14  ;;  %v4185_v7 = vadd.f32 %v3997_v5, %v1807_v41 }
 0x3af   :  { %v4178_v27 = vpop.eup %3409  ;;  %v2120_v47 = vadd.f32 1.0, %v4173_v18  ;;  %3423 = vpow2.f32 %v2045_v13  ;;  %v2051_v40 = vmul.f32 1.442695, %v1983_v36  ;;  %v1986_v21 = vsub.f32 0.0, %v1938_v37 }
 0x3b0   :  { %v2310_v10 = vsel %vm2214_vm11, %v3406_v8, %v2262_v2  ;;  %v2125_v53 = vadd.f32 1.0, %v4178_v27  ;;  %v1936_v29 = vand.u32 2147483647, %v4185_v7  ;;  %v1941_v28 = vand.u32 2147483647, %v4189_v25 }
 0x3b1   :  { %v2805_v38 = vpack.c.bf16 %v2310_v10, %v2309_v32  ;;  %3425 = vrcp.f32 %v2120_v47  ;;  %v2057_v56 = vmul.f32 1.442695, %v1986_v21  ;;  %v1939_v51 = vand.u32 2147483647, %v4194_v52 }
 0x3b2   :  { %v3268_v45 = vpop.f32.mrb[72].mxu1  ;;  %3427 = vpow2.f32 %v2055_v9  ;;  %v1984_v33 = vsub.f32 0.0, %v1936_v29  ;;  %v2307_v55 = vsel %vm2211_vm10, %v3404_v42, %v2259_v39  ;;  %v1989_v30 = vsub.f32 0.0, %v1941_v28 }
 0x3b3   :  { %v3412_v46 = vpop.eup %3411  ;;  %2901 = vst [vmem:[#allocation2 + $0x28] sm:$0xff] %v2805_v38   ;;  %v1836_v41 = vpop.f32.mrb[73].mxu1  ;;  %3429 = vpow2.f32 %v2051_v40  ;;  %v1987_v42 = vsub.f32 0.0, %v1939_v51  ;;  %v4229_v9 = vadd.f32 %v3997_v5, %v4171_v15  ;;  %v4236_v36 = vadd.f32 %v3268_v45, %v3997_v5 }
 0x3b4   :  { %v3414_v54 = vpop.eup %3413  ;;  %v2260_v12 = vmul.f32 %v3412_v46, %v4134_v43  ;;  %v3269_v34 = vpop.f32.mrb[74].mxu1  ;;  %3431 = vrcp.f32 %v2125_v53  ;;  %v2053_v35 = vmul.f32 1.442695, %v1984_v33  ;;  %v2063_v23 = vmul.f32 1.442695, %v1989_v30 }
 0x3b5   :  { %v3416_v59 = vpop.eup %3415  ;;  %v2265_v60 = vmul.f32 %v3414_v54, %v4142_v49  ;;  %v4200_v63 = vpop.f32.mrb[75].mxu1  ;;  %3433 = vpow2.f32 %v2057_v56  ;;  %v2059_v2 = vmul.f32 1.442695, %v1987_v42  ;;  %v4245_v38 = vadd.f32 %v3997_v5, %v1836_v41 }
 0x3b6   :  { %v3418_v0 = vpop.eup %3417  ;;  %v2308_v43 = vsel %vm2212_vm12, %v3412_v46, %v2260_v12  ;;  %v2263_v11 = vmul.f32 %v3416_v59, %v4148_v57  ;;  %3435 = vpow2.f32 %v2053_v35  ;;  %v4225_v57 = vadd.f32 %v4167_v62, %v3997_v5 }
 0x3b7   :  { %v4206_v3 = vpop.eup %3419  ;;  %v2800_v4 = vpack.c.bf16 %v2308_v43, %v2307_v55  ;;  %v2266_v49 = vmul.f32 %v3418_v0, %v4155_v61  ;;  %v2313_v14 = vsel %vm2217_vm13, %v3414_v54, %v2265_v60  ;;  %v1940_v40 = vand.u32 2147483647, %v4229_v9 }
 0x3b8   :  { %v4210_v58 = vpop.eup %3421  ;;  %v2123_v1 = vadd.f32 1.0, %v4206_v3  ;;  %v2311_v62 = vsel %vm2215_vm15, %v3416_v59, %v2263_v11  ;;  %v1942_v15 = vand.u32 2147483647, %v4225_v57  ;;  %v4255_v54 = vadd.f32 %v3269_v34, %v3997_v5 }
 0x3b9   :  { %v4216_v13 = vpop.eup %3423  ;;  %2900 = vst [vmem:[#allocation2 + $0x20] sm:$0xff] %v2800_v4   ;;  %v2314_v8 = vsel %vm2218_vm14, %v3418_v0, %v2266_v49  ;;  %v2126_v20 = vadd.f32 1.0, %v4210_v58  ;;  %v1988_v12 = vsub.f32 0.0, %v1940_v40  ;;  %v1945_v56 = vand.u32 2147483647, %v4236_v36 }
 0x3ba   :  { %v2815_v61 = vpack.c.bf16 %v2314_v8, %v2313_v14  ;;  %3437 = vrcp.f32 %v2123_v1  ;;  %v2124_v22 = vadd.f32 1.0, %v4216_v13  ;;  %v4220_v16 = vpop.f32.mrb[76].mxu1  ;;  %v1990_v29 = vsub.f32 0.0, %v1942_v15 }
 0x3bb   :  { %v3426_v47 = vpop.eup %3425  ;;  %3439 = vrcp.f32 %v2126_v20  ;;  %v4231_v32 = vpop.f32.mrb[77].mxu1  ;;  %vm2222_vm3 = vcmp.ge.f32.partialorder %v4121_v26, 0.0  ;;  %v2061_v33 = vmul.f32 1.442695, %v1988_v12  ;;  %v1993_v34 = vsub.f32 0.0, %v1945_v56 }
 0x3bc   :  { %2903 = vst [vmem:[#allocation2 + $0x38] sm:$0xff] %v2815_v61   ;;  %v2264_v10 = vmul.f32 %v3426_v47, %v4173_v18  ;;  %3441 = vrcp.f32 %v2124_v22  ;;  %v4238_v19 = vpop.f32.mrb[78].mxu1  ;;  %v4240_v37 = vpop.eup %3427  ;;  %v2065_v59 = vmul.f32 1.442695, %v1990_v29  ;;  %v1943_v51 = vand.u32 2147483647, %v4245_v38 }
 0x3bd   :  { %3443 = vpow2.f32 %v2063_v23  ;;  %v4247_v44 = vpop.f32.mrb[79].mxu1  ;;  %v4249_v18 = vpop.eup %3429  ;;  %v2129_v39 = vadd.f32 1.0, %v4240_v37  ;;  %vm2220_vm4 = vcmp.ge.f32.partialorder %v4126_v31, 0.0  ;;  %v1946_v55 = vand.u32 2147483647, %v4255_v54 }
 0x3be   :  { %v2312_v53 = vsel %vm2216_vm0, %v3426_v47, %v2264_v10  ;;  %3445 = vpow2.f32 %v2059_v2  ;;  %v3432_v21 = vpop.eup %3431  ;;  %v2127_v46 = vadd.f32 1.0, %v4249_v18  ;;  %v4271_v43 = vadd.f32 %v3997_v5, %v4200_v63 }
 0x3bf   :  { %v2810_v45 = vpack.c.bf16 %v2312_v53, %v2311_v62  ;;  %v4257_v41 = vpop.eup %3433  ;;  %3447 = vrcp.f32 %v2129_v39  ;;  %v2269_v60 = vmul.f32 %v3432_v21, %v4178_v27  ;;  %v2071_v49 = vmul.f32 1.442695, %v1993_v34 }
 0x3c0   :  { %3449 = vrcp.f32 %v2127_v46  ;;  %v2130_v28 = vadd.f32 1.0, %v4257_v41  ;;  %v4265_v0 = vpop.eup %3435  ;;  %v1991_v35 = vsub.f32 0.0, %v1943_v51  ;;  %vm2225_vm5 = vcmp.ge.f32.partialorder %v4140_v48, 0.0 }
 0x3c1   :  { %2902 = vst [vmem:[#allocation2 + $0x30] sm:$0xff] %v2810_v45   ;;  %v2128_v27 = vadd.f32 1.0, %v4265_v0  ;;  %v1994_v42 = vsub.f32 0.0, %v1946_v55  ;;  %v1944_v63 = vand.u32 2147483647, %v4271_v43  ;;  %v2317_v23 = vsel %vm2221_vm1, %v3432_v21, %v2269_v60 }
 0x3c2   :  { %3451 = vrcp.f32 %v2130_v28  ;;  %v4273_v30 = vpop.f32.mrb[80].mxu1  ;;  %v2067_v22 = vmul.f32 1.442695, %v1991_v35  ;;  %v4303_v46 = vadd.f32 %v4220_v16, %v3997_v5  ;;  %v4310_v31 = vadd.f32 %v3997_v5, %v4231_v32 }
 0x3c3   :  { %3453 = vpow2.f32 %v2065_v59  ;;  %v4276_v14 = vpop.f32.mrb[81].mxu1  ;;  %v2073_v62 = vmul.f32 1.442695, %v1994_v42  ;;  %v1992_v53 = vsub.f32 0.0, %v1944_v63  ;;  %v4314_v56 = vadd.f32 %v4238_v19, %v3997_v5 }
 0x3c4   :  { %v3438_v4 = vpop.eup %3437  ;;  %3455 = vpow2.f32 %v2061_v33  ;;  %v4281_v8 = vpop.f32.mrb[82].mxu1  ;;  %vm2223_vm6 = vcmp.ge.f32.partialorder %v4161_v6, 0.0  ;;  %v1949_v59 = vand.u32 2147483647, %v4303_v46  ;;  %vm2226_vm7 = vcmp.ge.f32.partialorder %v4165_v17, 0.0 }
 0x3c5   :  { %v3440_v11 = vpop.eup %3439  ;;  %v2267_v1 = vmul.f32 %v3438_v4, %v4206_v3  ;;  %3457 = vrcp.f32 %v2128_v27  ;;  %v4286_v2 = vpop.f32.mrb[83].mxu1  ;;  %v2069_v45 = vmul.f32 1.442695, %v1992_v53  ;;  %v1947_v32 = vand.u32 2147483647, %v4310_v31 }
 0x3c6   :  { %v3442_v20 = vpop.eup %3441  ;;  %v2270_v61 = vmul.f32 %v3440_v11, %v4210_v58  ;;  %3459 = vpow2.f32 %v2071_v49  ;;  %v1950_v19 = vand.u32 2147483647, %v4314_v56  ;;  %vm2224_vm8 = vcmp.ge.f32.partialorder %v4185_v7, 0.0 }
 0x3c7   :  { %v4288_v47 = vpop.eup %3443  ;;  %v2315_v3 = vsel %vm2219_vm2, %v3438_v4, %v2267_v1  ;;  %v2268_v10 = vmul.f32 %v3442_v20, %v4216_v13  ;;  %3461 = vpow2.f32 %v2067_v22  ;;  %v1997_v55 = vsub.f32 0.0, %v1949_v59 }
 0x3c8   :  { %v4293_v15 = vpop.eup %3445  ;;  %v2318_v50 = vsel %vm2222_vm3, %v3440_v11, %v2270_v61  ;;  %v2133_v58 = vadd.f32 1.0, %v4288_v47  ;;  %3463 = vpow2.f32 %v2073_v62  ;;  %v1995_v49 = vsub.f32 0.0, %v1947_v32 }
 0x3c9   :  { %v2825_v39 = vpack.c.bf16 %v2318_v50, %v2317_v23  ;;  %v2316_v40 = vsel %vm2220_vm4, %v3442_v20, %v2268_v10  ;;  %v2131_v24 = vadd.f32 1.0, %v4293_v15  ;;  %v3448_v21 = vpop.eup %3447  ;;  %v1998_v35 = vsub.f32 0.0, %v1950_v19 }
 0x3ca   :  { %v2820_v13 = vpack.c.bf16 %v2316_v40, %v2315_v3  ;;  %3465 = vrcp.f32 %v2133_v58  ;;  %v4305_v26 = vpop.f32.mrb[84].mxu1  ;;  %v3450_v29 = vpop.eup %3449  ;;  %v2273_v12 = vmul.f32 %v3448_v21, %v4240_v37  ;;  %v4339_v11 = vadd.f32 %v3997_v5, %v4247_v44 }
 0x3cb   :  { %2905 = vst [vmem:[#allocation2 + $0x48] sm:$0xff] %v2825_v39   ;;  %3467 = vrcp.f32 %v2131_v24  ;;  %v4316_v28 = vpop.f32.mrb[85].mxu1  ;;  %v2271_v16 = vmul.f32 %v3450_v29, %v4249_v18  ;;  %v2079_v63 = vmul.f32 1.442695, %v1997_v55  ;;  %v4351_v44 = vadd.f32 %v4273_v30, %v3997_v5 }
 0x3cc   :  { %2904 = vst [vmem:[#allocation2 + $0x40] sm:$0xff] %v2820_v13   ;;  %3469 = vpow2.f32 %v2069_v45  ;;  %v4321_v37 = vpop.f32.mrb[86].mxu1  ;;  %v3452_v60 = vpop.eup %3451  ;;  %v2321_v51 = vsel %vm2225_vm5, %v3448_v21, %v2273_v12  ;;  %v2075_v17 = vmul.f32 1.442695, %v1995_v49  ;;  %v1948_v3 = vand.u32 2147483647, %v4339_v11 }
 0x3cd   :  { %v4326_v33 = vpop.f32.mrb[87].mxu1  ;;  %v4328_v34 = vpop.eup %3453  ;;  %v2274_v18 = vmul.f32 %v3452_v60, %v4257_v41  ;;  %v2319_v48 = vsel %vm2223_vm6, %v3450_v29, %v2271_v16  ;;  %v2081_v30 = vmul.f32 1.442695, %v1998_v35  ;;  %vm2229_vm9 = vcmp.ge.f32.partialorder %v4189_v25, 0.0 }
 0x3ce   :  { %v4334_v4 = vpop.eup %3455  ;;  %v2134_v27 = vadd.f32 1.0, %v4328_v34  ;;  %v1996_v24 = vsub.f32 0.0, %v1948_v3  ;;  %vm2227_vm10 = vcmp.ge.f32.partialorder %v4194_v52, 0.0  ;;  %v1953_v7 = vand.u32 2147483647, %v4351_v44 }
 0x3cf   :  { %v3458_v1 = vpop.eup %3457  ;;  %v2322_v41 = vsel %vm2226_vm7, %v3452_v60, %v2274_v18  ;;  %v2132_v42 = vadd.f32 1.0, %v4334_v4  ;;  %vm2230_vm11 = vcmp.ge.f32.partialorder %v4225_v57, 0.0  ;;  %v4379_v16 = vadd.f32 %v3997_v5, %v4276_v14 }
 0x3d0   :  { %v4346_v20 = vpop.eup %3459  ;;  %v2835_v23 = vpack.c.bf16 %v2322_v41, %v2321_v51  ;;  %v2272_v61 = vmul.f32 %v3458_v1, %v4265_v0  ;;  %3471 = vrcp.f32 %v2134_v27  ;;  %v2077_v12 = vmul.f32 1.442695, %v1996_v24 }
 0x3d1   :  { %v4353_v22 = vpop.eup %3461  ;;  %3473 = vrcp.f32 %v2132_v42  ;;  %v2137_v6 = vadd.f32 1.0, %v4346_v20  ;;  %v2001_v32 = vsub.f32 0.0, %v1953_v7  ;;  %vm2228_vm12 = vcmp.ge.f32.partialorder %v4229_v9, 0.0 }
 0x3d2   :  { %v4357_v10 = vpop.f32.mrb[88].mxu1  ;;  %v4359_v62 = vpop.eup %3463  ;;  %2907 = vst [vmem:[#allocation2 + $0x58] sm:$0xff] %v2835_v23   ;;  %v2320_v0 = vsel %vm2224_vm8, %v3458_v1, %v2272_v61  ;;  %v2135_v50 = vadd.f32 1.0, %v4353_v22  ;;  %3475 = vpow2.f32 %v2079_v63  ;;  %v1951_v51 = vand.u32 2147483647, %v4379_v16 }
 0x3d3   :  { %v4364_v58 = vpop.f32.mrb[89].mxu1  ;;  %v2830_v39 = vpack.c.bf16 %v2320_v0, %v2319_v48  ;;  %3477 = vrcp.f32 %v2137_v6  ;;  %v2138_v40 = vadd.f32 1.0, %v4359_v62  ;;  %vm2233_vm13 = vcmp.ge.f32.partialorder %v4236_v36, 0.0 }
 0x3d4   :  { %v3466_v53 = vpop.eup %3465  ;;  %v4367_v21 = vpop.f32.mrb[90].mxu1  ;;  %3479 = vrcp.f32 %v2135_v50  ;;  %v2087_v18 = vmul.f32 1.442695, %v2001_v32  ;;  %v4389_v14 = vadd.f32 %v4281_v8, %v3997_v5  ;;  %vm2231_vm14 = vcmp.ge.f32.partialorder %v4245_v38, 0.0  ;;  %v3547_v38 = vld [vmem:[%s4527_s8] ss:$0 sm:$0xff] }
 0x3d5   :  { %v3468_v13 = vpop.eup %3467  ;;  %v4372_v45 = vpop.f32.mrb[91].mxu1  ;;  %2906 = vst [vmem:[#allocation2 + $0x50] sm:$0xff] %v2830_v39   ;;  %3481 = vrcp.f32 %v2138_v40  ;;  %v2277_v59 = vmul.f32 %v3466_v53, %v4288_v47  ;;  %v4393_v47 = vadd.f32 %v3997_v5, %v4286_v2  ;;  %vm2234_vm15 = vcmp.ge.f32.partialorder %v4255_v54, 0.0  ;;  %s3572_s8 = smov [#allocation2]  }
 0x3d6   :  { %v4374_v29 = vpop.eup %3469  ;;  %3483 = vpow2.f32 %v2075_v17  ;;  %v2275_v19 = vmul.f32 %v3468_v13, %v4293_v15  ;;  %v1999_v15 = vsub.f32 0.0, %v1951_v51  ;;  %v4399_v55 = vadd.f32 %v4305_v26, %v3997_v5  ;;  %s2592_s21 = sshll.u32 %s3572_s8, 4  ;;  %s2593_s21 = int_to_ptr.vmem [resolvable:$true] %s2592_s21 }
 0x3d7   :  { %v2136_v60 = vadd.f32 1.0, %v4374_v29  ;;  %3485 = vpow2.f32 %v2081_v30  ;;  %v2325_v49 = vsel %vm2229_vm9, %v3466_v53, %v2277_v59  ;;  %v1954_v8 = vand.u32 2147483647, %v4389_v14  ;;  %s3548_s22 = scalar_lea.vmem %s2593_s21, 3072  ;;  %p3553_p1 = scmp.lt.s32.totalorder %s2593_s21, %s2593_s21 }
 0x3d8   :  { %v1952_v2 = vand.u32 2147483647, %v4393_v47  ;;  %v2323_v1 = vsel %vm2227_vm10, %v3468_v13, %v2275_v19  ;;  %v2083_v41 = vmul.f32 1.442695, %v1999_v15  ;;  %v1957_v42 = vand.u32 2147483647, %v4399_v55  ;;  %p3549_p0 = scmp.ne.s32.totalorder %s2593_s21, %s3548_s22  ;;  %p3554_p2 = scmp.lt.s32.totalorder %s3548_s22, %s3548_s22 }
 0x3d9   :  { %3487 = vrcp.f32 %v2136_v60  ;;  %v2002_v25 = vsub.f32 0.0, %v1954_v8  ;;  %v4414_v61 = vadd.f32 %v3997_v5, %v4316_v28  ;;  %vm2232_vm0 = vcmp.ge.f32.partialorder %v4271_v43, 0.0 }
 0x3da   :  { %3489 = vpow2.f32 %v2077_v12  ;;  %v3472_v27 = vpop.eup %3471  ;;  %v2000_v23 = vsub.f32 0.0, %v1952_v2  ;;  %v4448_v54 = vadd.f32 %v3547_v38, %v4321_v37  ;;  %v4451_v15 = vadd.f32 %v3547_v38, %v4326_v33  ;;  %p3555_p3 = por %p3554_p2, %p3553_p1 }
 0x3db   :  { %3491 = vpow2.f32 %v2087_v18  ;;  %v3474_v35 = vpop.eup %3473  ;;  %v2278_v48 = vmul.f32 %v3472_v27, %v4328_v34  ;;  %v2005_v34 = vsub.f32 0.0, %v1957_v42  ;;  %v2089_v30 = vmul.f32 1.442695, %v2002_v25 }
 0x3dc   :  { %v4409_v26 = vpop.eup %3475  ;;  %v2276_v63 = vmul.f32 %v3474_v35, %v4334_v4  ;;  %3493 = vpow2.f32 %v2083_v41  ;;  %v2085_v28 = vmul.f32 1.442695, %v2000_v23  ;;  %v4457_v8 = vadd.f32 %v3547_v38, %v4357_v10  ;;  %p3556_p4 = pnand %p3555_p3, %p3549_p0 }
 0x3dd   :  { %v3478_v6 = vpop.eup %3477  ;;  %v2326_v52 = vsel %vm2230_vm11, %v3472_v27, %v2278_v48  ;;  %v2141_v17 = vadd.f32 1.0, %v4409_v26  ;;  %v2095_v24 = vmul.f32 1.442695, %v2005_v34  ;;  %v1956_v37 = vand.u32 2147483647, %v4451_v15 }
 0x3de   :  { %v3480_v3 = vpop.eup %3479  ;;  %v2845_v0 = vpack.c.bf16 %v2326_v52, %v2325_v49  ;;  %v2324_v50 = vsel %vm2228_vm12, %v3474_v35, %v2276_v63  ;;  %v2281_v4 = vmul.f32 %v3478_v6, %v4346_v20  ;;  %v1958_v35 = vand.u32 2147483647, %v4448_v54 }
 0x3df   :  { %v3482_v53 = vpop.eup %3481  ;;  %v2840_v39 = vpack.c.bf16 %v2324_v50, %v2323_v1  ;;  %v2279_v5 = vmul.f32 %v3480_v3, %v4353_v22  ;;  %3495 = vrcp.f32 %v2141_v17  ;;  %v1955_v22 = vand.u32 2147483647, %v4414_v61 }
 0x3e0   :  { %v4423_v57 = vpop.eup %3483  ;;  %2909 = vst [vmem:[#allocation2 + $0x68] sm:$0xff] %v2845_v0   ;;  %v2282_v40 = vmul.f32 %v3482_v53, %v4359_v62  ;;  %3497 = vpow2.f32 %v2089_v30  ;;  %v2329_v20 = vsel %vm2233_vm13, %v3478_v6, %v2281_v4  ;;  %v1961_v33 = vand.u32 2147483647, %v4457_v8 }
 0x3e1   :  { %v4427_v9 = vpop.eup %3485  ;;  %2908 = vst [vmem:[#allocation2 + $0x60] sm:$0xff] %v2840_v39   ;;  %v2139_v13 = vadd.f32 1.0, %v4423_v57  ;;  %3499 = vpow2.f32 %v2085_v28  ;;  %v2327_v12 = vsel %vm2231_vm14, %v3480_v3, %v2279_v5  ;;  %v2003_v19 = vsub.f32 0.0, %v1955_v22 }
 0x3e2   :  { %v2330_v62 = vsel %vm2234_vm15, %v3482_v53, %v2282_v40  ;;  %v2142_v59 = vadd.f32 1.0, %v4427_v9  ;;  %3501 = vpow2.f32 %v2095_v24  ;;  %v2006_v48 = vsub.f32 0.0, %v1958_v35 }
 0x3e3   :  { %v3488_v7 = vpop.eup %3487  ;;  %v2855_v32 = vpack.c.bf16 %v2330_v62, %v2329_v20  ;;  %3503 = vrcp.f32 %v2139_v13  ;;  %v2091_v49 = vmul.f32 1.442695, %v2003_v19  ;;  %v2004_v42 = vsub.f32 0.0, %v1956_v37 }
 0x3e4   :  { %v4438_v60 = vpop.eup %3489  ;;  %v2280_v36 = vmul.f32 %v3488_v7, %v4374_v29  ;;  %3505 = vrcp.f32 %v2142_v59  ;;  %v2009_v10 = vsub.f32 0.0, %v1961_v33  ;;  %v4466_v63 = vadd.f32 %v3547_v38, %v4364_v58 }
 0x3e5   :  { %v4441_v51 = vpop.eup %3491  ;;  %v2140_v18 = vadd.f32 1.0, %v4438_v60  ;;  %2911 = vst [vmem:[#allocation2 + $0x78] sm:$0xff] %v2855_v32   ;;  %v4469_v25 = vadd.f32 %v3547_v38, %v4367_v21  ;;  %v2097_v6 = vmul.f32 1.442695, %v2006_v48  ;;  %v4472_v52 = vadd.f32 %v3547_v38, %v4372_v45 }
 0x3e6   :  { %v2328_v29 = vsel %vm2232_vm0, %v3488_v7, %v2280_v36  ;;  %v2145_v27 = vadd.f32 1.0, %v4441_v51  ;;  %v4460_v1 = vpop.eup %3493  ;;  %vm2237_vm1 = vcmp.ge.f32.partialorder %v4303_v46, 0.0  ;;  %v2093_v58 = vmul.f32 1.442695, %v2004_v42 }
 0x3e7   :  { %v2850_v2 = vpack.c.bf16 %v2328_v29, %v2327_v12  ;;  %3507 = vrcp.f32 %v2140_v18  ;;  %v2143_v43 = vadd.f32 1.0, %v4460_v1  ;;  %v1959_v21 = vand.u32 2147483647, %v4466_v63 }
 0x3e8   :  { %3509 = vrcp.f32 %v2145_v27  ;;  %vm2235_vm2 = vcmp.ge.f32.partialorder %v4310_v31, 0.0  ;;  %v2103_v30 = vmul.f32 1.442695, %v2009_v10  ;;  %v1962_v45 = vand.u32 2147483647, %v4469_v25 }
 0x3e9   :  { %2910 = vst [vmem:[#allocation2 + $0x70] sm:$0xff] %v2850_v2   ;;  %3511 = vpow2.f32 %v2091_v49  ;;  %v3496_v41 = vpop.eup %3495  ;;  %vm2238_vm3 = vcmp.ge.f32.partialorder %v4314_v56, 0.0  ;;  %v1960_v39 = vand.u32 2147483647, %v4472_v52  ;;  %vm2236_vm4 = vcmp.ge.f32.partialorder %v4339_v11, 0.0 }
 0x3ea   :  { %v3498_v23 = vpop.eup %3497  ;;  %3513 = vrcp.f32 %v2143_v43  ;;  %v2285_v34 = vmul.f32 %v3496_v41, %v4409_v26  ;;  %v2007_v26 = vsub.f32 0.0, %v1959_v21  ;;  %v2010_v24 = vsub.f32 0.0, %v1962_v45 }
 0x3eb   :  { %v3500_v17 = vpop.eup %3499  ;;  %v2146_v3 = vadd.f32 1.0, %v3498_v23  ;;  %3515 = vpow2.f32 %v2097_v6  ;;  %v2008_v7 = vsub.f32 0.0, %v1960_v39  ;;  %vm2241_vm5 = vcmp.ge.f32.partialorder %v4351_v44, 0.0 }
 0x3ec   :  { %v4476_v0 = vpop.eup %3501  ;;  %v2144_v50 = vadd.f32 1.0, %v3500_v17  ;;  %v2333_v5 = vsel %vm2237_vm1, %v3496_v41, %v2285_v34  ;;  %v2099_v22 = vmul.f32 1.442695, %v2007_v26  ;;  %v2105_v59 = vmul.f32 1.442695, %v2010_v24 }
 0x3ed   :  { %v3504_v4 = vpop.eup %3503  ;;  %3517 = vrcp.f32 %v2146_v3  ;;  %v2149_v13 = vadd.f32 1.0, %v4476_v0  ;;  %vm2242_vm6 = vcmp.ge.f32.partialorder %v4389_v14, 0.0  ;;  %vm2239_vm7 = vcmp.ge.f32.partialorder %v4379_v16, 0.0 }
 0x3ee   :  { %v3506_v53 = vpop.eup %3505  ;;  %3519 = vrcp.f32 %v2144_v50  ;;  %v2283_v28 = vmul.f32 %v3504_v4, %v4423_v57  ;;  %v2101_v57 = vmul.f32 1.442695, %v2008_v7  ;;  %vm2240_vm8 = vcmp.ge.f32.partialorder %v4393_v47, 0.0 }
 0x3ef   :  { %v2286_v40 = vmul.f32 %v3506_v53, %v4427_v9  ;;  %3521 = vpow2.f32 %v2093_v58  ;;  %vm2245_vm9 = vcmp.ge.f32.partialorder %v4399_v55, 0.0  ;;  %vm2246_vm10 = vcmp.ge.f32.partialorder %v4448_v54, 0.0 }
 0x3f0   :  { %3523 = vpow2.f32 %v2103_v30  ;;  %v2331_v9 = vsel %vm2235_vm2, %v3504_v4, %v2283_v28  ;;  %vm2243_vm11 = vcmp.ge.f32.partialorder %v4414_v61, 0.0  ;;  %vm2244_vm12 = vcmp.ge.f32.partialorder %v4451_v15, 0.0 }
 0x3f1   :  { %v3508_v20 = vpop.eup %3507  ;;  %v2334_v56 = vsel %vm2238_vm3, %v3506_v53, %v2286_v40  ;;  %3525 = vpow2.f32 %v2099_v22  ;;  %vm2249_vm13 = vcmp.ge.f32.partialorder %v4457_v8, 0.0  ;;  %vm2250_vm14 = vcmp.ge.f32.partialorder %v4469_v25, 0.0 }
 0x3f2   :  { %v3510_v12 = vpop.eup %3509  ;;  %v2284_v62 = vmul.f32 %v3508_v20, %v4438_v60  ;;  %v2865_v46 = vpack.c.bf16 %v2334_v56, %v2333_v5  ;;  %3527 = vpow2.f32 %v2105_v59  ;;  %vm2247_vm15 = vcmp.ge.f32.partialorder %v4466_v63, 0.0 }
 0x3f3   :  { %v3512_v32 = vpop.eup %3511  ;;  %3529 = vpow2.f32 %v2101_v57  ;;  %v2289_v29 = vmul.f32 %v3510_v12, %v4441_v51  ;;  %vm2248_vm0 = vcmp.ge.f32.partialorder %v4472_v52, 0.0 }
 0x3f4   :  { %v2332_v36 = vsel %vm2236_vm4, %v3508_v20, %v2284_v62  ;;  %v3514_v19 = vpop.eup %3513  ;;  %2913 = vst [vmem:[#allocation2 + $0x88] sm:$0xff] %v2865_v46   ;;  %v2147_v38 = vadd.f32 1.0, %v3512_v32  ;;  %3531 = vrcp.f32 %v2149_v13 }
 0x3f5   :  { %v2860_v18 = vpack.c.bf16 %v2332_v36, %v2331_v9  ;;  %v3516_v60 = vpop.eup %3515  ;;  %v2287_v11 = vmul.f32 %v3514_v19, %v4460_v1  ;;  %v2337_v33 = vsel %vm2241_vm5, %v3510_v12, %v2289_v29 }
 0x3f6   :  { %v2150_v49 = vadd.f32 1.0, %v3516_v60  ;;  %3533 = vrcp.f32 %v2147_v38 }
 0x3f7   :  { %2912 = vst [vmem:[#allocation2 + $0x80] sm:$0xff] %v2860_v18   ;;  %v3518_v27 = vpop.eup %3517  ;;  %v2335_v48 = vsel %vm2239_vm7, %v3514_v19, %v2287_v11 }
 0x3f8   :  { %v3520_v2 = vpop.eup %3519  ;;  %v2290_v35 = vmul.f32 %v3518_v27, %v3498_v23  ;;  %3535 = vrcp.f32 %v2150_v49 }
 0x3f9   :  { %v2288_v31 = vmul.f32 %v3520_v2, %v3500_v17  ;;  %v3522_v37 = vpop.eup %3521 }
 0x3fa   :  { %v2338_v43 = vsel %vm2242_vm6, %v3518_v27, %v2290_v35  ;;  %v3524_v51 = vpop.eup %3523  ;;  %v2148_v42 = vadd.f32 1.0, %v3522_v37 }
 0x3fb   :  { %v2875_v1 = vpack.c.bf16 %v2338_v43, %v2337_v33  ;;  %v2336_v41 = vsel %vm2240_vm8, %v3520_v2, %v2288_v31  ;;  %v3526_v10 = vpop.eup %3525  ;;  %v2153_v6 = vadd.f32 1.0, %v3524_v51 }
 0x3fc   :  { %v2870_v23 = vpack.c.bf16 %v2336_v41, %v2335_v48  ;;  %v3528_v44 = vpop.eup %3527  ;;  %3537 = vrcp.f32 %v2148_v42  ;;  %v2151_v14 = vadd.f32 1.0, %v3526_v10 }
 0x3fd   :  { %2915 = vst [vmem:[#allocation2 + $0x98] sm:$0xff] %v2875_v1   ;;  %v3530_v17 = vpop.eup %3529  ;;  %3539 = vrcp.f32 %v2153_v6  ;;  %v2154_v34 = vadd.f32 1.0, %v3528_v44 }
 0x3fe   :  { %2914 = vst [vmem:[#allocation2 + $0x90] sm:$0xff] %v2870_v23   ;;  %v3532_v16 = vpop.eup %3531  ;;  %3541 = vrcp.f32 %v2151_v14  ;;  %v2152_v3 = vadd.f32 1.0, %v3530_v17 }
 0x3ff   :  { %3543 = vrcp.f32 %v2154_v34  ;;  %v2293_v50 = vmul.f32 %v3532_v16, %v4476_v0 }
 0x400   :  { %3545 = vrcp.f32 %v2152_v3  ;;  %v3534_v47 = vpop.eup %3533 }
 0x401   :  { %v2341_v4 = vsel %vm2245_vm9, %v3532_v16, %v2293_v50  ;;  %v2291_v30 = vmul.f32 %v3534_v47, %v3512_v32 }
 0x402   :  { %v3536_v58 = vpop.eup %3535 }
 0x403   :  { %v2294_v21 = vmul.f32 %v3536_v58, %v3516_v60  ;;  %v2339_v24 = vsel %vm2243_vm11, %v3534_v47, %v2291_v30 }
 0x405   :  { %v2342_v45 = vsel %vm2246_vm10, %v3536_v58, %v2294_v21 }
 0x406   :  { %v3538_v53 = vpop.eup %3537  ;;  %v2885_v26 = vpack.c.bf16 %v2342_v45, %v2341_v4 }
 0x407   :  { %v3540_v39 = vpop.eup %3539  ;;  %v2292_v5 = vmul.f32 %v3538_v53, %v3522_v37 }
 0x408   :  { %v3542_v28 = vpop.eup %3541  ;;  %2917 = vst [vmem:[#allocation2 + $0xa8] sm:$0xff] %v2885_v26   ;;  %v2297_v0 = vmul.f32 %v3540_v39, %v3524_v51 }
 0x409   :  { %v3544_v40 = vpop.eup %3543  ;;  %v2340_v20 = vsel %vm2244_vm12, %v3538_v53, %v2292_v5  ;;  %v2295_v55 = vmul.f32 %v3542_v28, %v3526_v10 }
 0x40a   :  { %v3546_v13 = vpop.eup %3545  ;;  %v2880_v54 = vpack.c.bf16 %v2340_v20, %v2339_v24  ;;  %v2298_v22 = vmul.f32 %v3544_v40, %v3528_v44  ;;  %v2345_v61 = vsel %vm2249_vm13, %v3540_v39, %v2297_v0 }
 0x40b   :  { %v2296_v7 = vmul.f32 %v3546_v13, %v3530_v17  ;;  %v2343_v12 = vsel %vm2247_vm15, %v3542_v28, %v2295_v55 }
 0x40c   :  { %2916 = vst [vmem:[#allocation2 + $0xa0] sm:$0xff] %v2880_v54   ;;  %v2346_v15 = vsel %vm2250_vm14, %v3544_v40, %v2298_v22 }
 0x40d   :  { %v2895_v56 = vpack.c.bf16 %v2346_v15, %v2345_v61  ;;  %v2344_v62 = vsel %vm2248_vm0, %v3546_v13, %v2296_v7 }
 0x40e   :  { %v2890_v59 = vpack.c.bf16 %v2344_v62, %v2343_v12 }
 0x40f   :  { %2919 = vst [vmem:[#allocation2 + $0xb8] sm:$0xff] %v2895_v56  }
 0x410   :  { %2918 = vst [vmem:[#allocation2 + $0xb0] sm:$0xff] %v2890_v59  }
 0x411   :  { %3559 = shalt.err (!%p3556_p4)
}
 0x412   :  { %s3560_s25 = scalar_lea.hbm %s4528_s9, 3072 }
 0x413   :  { %p3561_p5 = scmp.ne.s32.totalorder %s4528_s9, %s3560_s25  ;;  %p3564_p6 = scmp.lt.u32.totalorder %s3560_s25, %s4528_s9 }
 0x415   :  { %p3566_p7 = pnand %p3564_p6, %p3561_p5 }
 0x417   :  { %3569 = shalt.err (!%p3566_p7)
}
 0x418   :  { %s3573_s28 = smov 64   ;;  %s3574_s29 = smov 4  }
 0x419   :  { %2598 = dma.vmem_to_hbm [thread:$0]  %s2593_s21, 3072, %s4528_s9, [#allocation3], %s3573_s28, %s3573_s28, %s3574_s29  }
 0x41a   :  { %3570 = dma.done.wait [#allocation3], 3072  }
 0x41b   :  { %3571 = vsyncadd [#allocation3], 4294964224 }
 0x41c   :  { %2602 = vsyncpa [#allocation3], 1 }

</bundles_post_ra>
